<compile_context>
chip_gen: v7x
topology: tpu7x:2x2x1
jax: 0.10.0
libtpu: 0.0.40
codegen_flags: <defaults>
</compile_context>

<pallas_src>
import math

import jax
import jax.numpy as jnp
from jax.experimental import pallas as pl
from jax.experimental.pallas import tpu as pltpu

LOG2PI = math.log(2.0 * math.pi)


def _softplus(t):
    # softplus(t) = -log(sigmoid(-t)); numerically stable form, kept in f32.
    return jnp.maximum(t, 0.0) + jnp.log1p(jnp.exp(-jnp.abs(t)))


# --------------------------------------------------------------------------
# Fused Pallas kernel: encoder -> decoder+NLL -> adversary+BCE
# --------------------------------------------------------------------------

def avae_fused_kernel(
        # inputs
        x_ref, zprior_ref,
        ew1_ref, eb1_ref, ew2_ref, eb2_ref,
        dw1_ref, db1_ref, dw2_ref, db2_ref,
        awx_ref, awz_ref, ab1_ref, aw2_ref, ab2_ref,
        # outputs
        recon_ref, stats_ref,
        # scratch
        zz_ref, hh_ref):
    f32 = jnp.float32
    bf16 = jnp.bfloat16

    x = x_ref[...]                        # (B, D) f32 — kept f32 for the NLL diff
    x_bf = x.astype(bf16)                 # cast once for all MXU uses of x
    B = x.shape[0]
    D = x.shape[1]

    # ---------------- encoder: z = ReLU(x @ W1 + b1) @ W2 + b2 -------------
    h = jnp.dot(x_bf, ew1_ref[...], preferred_element_type=f32) + eb1_ref[...]
    h = jnp.maximum(h, 0.0)
    z = jnp.dot(h.astype(bf16), ew2_ref[...],
                preferred_element_type=f32) + eb2_ref[...]      # (B, Z), stays in VMEM

    # ---------------- decoder + DiagonalGaussian(mean, I) ------------------
    hd = jnp.dot(z.astype(bf16), dw1_ref[...],
                 preferred_element_type=f32) + db1_ref[...]
    hd = jnp.maximum(hd, 0.0)
    mean = jnp.dot(hd.astype(bf16), dw2_ref[...],
                   preferred_element_type=f32) + db2_ref[...]    # (B, D)
    recon_ref[...] = mean                                        # recon.mode()
    diff = x - mean
    # recon.nll(x) under N(mean, I); constant term hoisted out of the reduce.
    nll = 0.5 * jnp.sum(diff * diff, axis=-1, keepdims=True) + (0.5 * D) * LOG2PI  # (B, 1)

    # ---------------- adversary T(x, z) at posterior & prior z -------------
    # T(x, z) = ReLU(x @ Wx + z @ Wz + b1) @ W2 + b2   (concat split as Wx/Wz)
    # Stack the two z operands so Wz and W2 each see one MXU pass.
    zz_ref[0:B, :] = z
    zz_ref[B:2 * B, :] = zprior_ref[...]
    zw = jnp.dot(zz_ref[...].astype(bf16), awz_ref[...],
                 preferred_element_type=f32)                     # (2B, H)
    xw_b = jnp.dot(x_bf, awx_ref[...],
                   preferred_element_type=f32) + ab1_ref[...]    # (B, H), shared branch
    hh_ref[0:B, :] = xw_b
    hh_ref[B:2 * B, :] = xw_b
    hh = jnp.maximum(hh_ref[...] + zw, 0.0)                      # (2B, H)
    tt = jnp.dot(hh.astype(bf16), aw2_ref[...],
                 preferred_element_type=f32) + ab2_ref[...]      # (2B, 1)
    t_d = tt[0:B]
    t_i = tt[B:2 * B]

    # adv_loss = BCE(sigmoid(T_d), 1) + BCE(sigmoid(T_i), 0), reduction='mean'
    n = t_d.shape[0] * t_d.shape[1]
    adv = jnp.sum(_softplus(-t_d) + _softplus(t_i),
                  axis=(0, 1), keepdims=True) / n                # (1, 1)

    # -------- lane-dense packed small outputs (avoid last-dim-1 stores) ----
    # stats[:, 0] = nll,  stats[:, 1] = T_d,  stats[:, 2] = adv_loss
    col = jax.lax.broadcasted_iota(jnp.int32, stats_ref.shape, 1)
    stats_ref[...] = (jnp.where(col == 0, nll, 0.0)
                      + jnp.where(col == 1, t_d, 0.0)
                      + jnp.where(col == 2, adv, 0.0))


# --------------------------------------------------------------------------
# pallas_call wrapper (single invocation, no grid, no double-buffering)
# --------------------------------------------------------------------------

def _vmem_spec():
    return pl.BlockSpec(memory_space=pltpu.MemorySpace.VMEM)


@jax.jit
def avae_forward(x, params, prior_noise):
    """Returns (recon_mode, recon_nll, T_d, adv_loss) — same as AVAE.forward."""
    B = x.shape[0]
    xf = x.reshape(B, -1).astype(jnp.float32)
    D = xf.shape[1]
    Z = prior_noise.shape[1]
    H = params["enc_w1"].shape[1]

    args = (xf, prior_noise,
            params["enc_w1"], params["enc_b1"], params["enc_w2"], params["enc_b2"],
            params["dec_w1"], params["dec_b1"], params["dec_w2"], params["dec_b2"],
            params["adv_wx"], params["adv_wz"], params["adv_b1"],
            params["adv_w2"], params["adv_b2"])

    recon_flat, stats = pl.pallas_call(
        avae_fused_kernel,
        in_specs=[_vmem_spec() for _ in args],
        out_specs=(_vmem_spec(), _vmem_spec()),
        out_shape=(jax.ShapeDtypeStruct((B, D), jnp.float32),
                   jax.ShapeDtypeStruct((B, 128), jnp.float32)),
        scratch_shapes=[pltpu.VMEM((2 * B, Z), jnp.float32),   # stacked [z_post; z_prior]
                        pltpu.VMEM((2 * B, H), jnp.float32)],  # duplicated x@Wx + b1
        compiler_params=pltpu.CompilerParams(vmem_limit_bytes=32 * 1024 * 1024),
    )(*args)

    recon = recon_flat.reshape(x.shape)     # recon.mode() back to NCHW
    nll = stats[:, 0]                       # recon.nll(x)
    t_d = stats[:, 1:2]                     # T_d
    adv_loss = stats[0, 2]                  # adversary loss (scalar)
    return recon, nll, t_d, adv_loss


# --------------------------------------------------------------------------
# Parameter init (PyTorch nn.Linear default: U(-1/sqrt(fan_in), 1/sqrt(fan_in)))
# Weights stored bf16 (MXU operands), biases f32 (elementwise path).
# --------------------------------------------------------------------------

def _linear_init(key, fan_in, fan_out):
    wk, bk = jax.random.split(key)
    lim = 1.0 / math.sqrt(fan_in)
    w = jax.random.uniform(wk, (fan_in, fan_out), jnp.float32, -lim, lim)
    b = jax.random.uniform(bk, (1, fan_out), jnp.float32, -lim, lim)
    return w.astype(jnp.bfloat16), b


def init_params(key, d_in, hidden, z_dim):
    ks = jax.random.split(key, 7)
    p = {}
    # encoder MLP: D -> hidden -> z_dim
    p["enc_w1"], p["enc_b1"] = _linear_init(ks[0], d_in, hidden)
    p["enc_w2"], p["enc_b2"] = _linear_init(ks[1], hidden, z_dim)
    # decoder MLP: z_dim -> hidden -> D  (outputs Gaussian mean)
    p["dec_w1"], p["dec_b1"] = _linear_init(ks[2], z_dim, hidden)
    p["dec_w2"], p["dec_b2"] = _linear_init(ks[3], hidden, d_in)
    # adversary MLP on concat([x, z]): (D + z_dim) -> hidden -> 1
    # (the concat's first-layer weight is split into Wx and Wz)
    lim = 1.0 / math.sqrt(d_in + z_dim)
    kwx, kwz, kb = jax.random.split(ks[4], 3)
    p["adv_wx"] = jax.random.uniform(kwx, (d_in, hidden), jnp.float32,
                                     -lim, lim).astype(jnp.bfloat16)
    p["adv_wz"] = jax.random.uniform(kwz, (z_dim, hidden), jnp.float32,
                                     -lim, lim).astype(jnp.bfloat16)
    p["adv_b1"] = jax.random.uniform(kb, (1, hidden), jnp.float32, -lim, lim)
    p["adv_w2"], p["adv_b2"] = _linear_init(ks[5], hidden, 1)
    return p


if __name__ == "__main__":
    B, C, Himg, Wimg = 2, 4, 16, 16
    Z_DIM, HIDDEN = 64, 128
    D = C * Himg * Wimg

    key = jax.random.PRNGKey(0)
    kx, kz, kp = jax.random.split(key, 3)

    x = jax.random.normal(kx, (B, C, Himg, Wimg), jnp.float32)
    params = init_params(kp, D, HIDDEN, Z_DIM)
    # prior.sample(): z ~ N(0, I) of shape (B, z_dim)  (RNG lives in JAX glue)
    prior_noise = jax.random.normal(kz, (B, Z_DIM), jnp.float32)

    recon, nll, t_d, adv_loss = avae_forward(x, params, prior_noise)
    jax.block_until_ready((recon, nll, t_d, adv_loss))

    assert recon.shape == (B, C, Himg, Wimg)
    assert nll.shape == (B,)
    assert t_d.shape == (B, 1)
    assert adv_loss.shape == ()
    assert bool(jnp.all(jnp.isfinite(recon)))
    assert bool(jnp.all(jnp.isfinite(nll)))
    assert bool(jnp.isfinite(adv_loss))
    print("KERNEL_OK")
</pallas_src>

<mosaic_0001>
module attributes {stable_mosaic.version = 11 : i64} {
  func.func @avae_fused_kernel(%arg0: memref<2x1024xf32, #tpu.memory_space<vmem>>, %arg1: memref<2x64xf32, #tpu.memory_space<vmem>>, %arg2: memref<1024x128xbf16, #tpu.memory_space<vmem>>, %arg3: memref<1x128xf32, #tpu.memory_space<vmem>>, %arg4: memref<128x64xbf16, #tpu.memory_space<vmem>>, %arg5: memref<1x64xf32, #tpu.memory_space<vmem>>, %arg6: memref<64x128xbf16, #tpu.memory_space<vmem>>, %arg7: memref<1x128xf32, #tpu.memory_space<vmem>>, %arg8: memref<128x1024xbf16, #tpu.memory_space<vmem>>, %arg9: memref<1x1024xf32, #tpu.memory_space<vmem>>, %arg10: memref<1024x128xbf16, #tpu.memory_space<vmem>>, %arg11: memref<64x128xbf16, #tpu.memory_space<vmem>>, %arg12: memref<1x128xf32, #tpu.memory_space<vmem>>, %arg13: memref<128x1xbf16, #tpu.memory_space<vmem>>, %arg14: memref<1x1xf32, #tpu.memory_space<vmem>>, %arg15: memref<2x1024xf32, #tpu.memory_space<vmem>>, %arg16: memref<2x128xf32, #tpu.memory_space<vmem>>, %arg17: memref<4x64xf32, #tpu.memory_space<vmem>>, %arg18: memref<4x128xf32, #tpu.memory_space<vmem>>) attributes {dimension_semantics = [], scalar_prefetch = 0 : i64, scratch_operands = 2 : i64, tpu.core_type = #tpu.core_type<tc>} {
    %c0 = arith.constant 0 : index
    %c0_0 = arith.constant 0 : index
    %0 = vector.load %arg0[%c0, %c0_0] : memref<2x1024xf32, #tpu.memory_space<vmem>>, vector<2x1024xf32>
    %1 = arith.truncf %0 : vector<2x1024xf32> to vector<2x1024xbf16>
    %c0_1 = arith.constant 0 : index
    %c0_2 = arith.constant 0 : index
    %2 = vector.load %arg2[%c0_1, %c0_2] : memref<1024x128xbf16, #tpu.memory_space<vmem>>, vector<1024x128xbf16>
    %cst = arith.constant dense<0.000000e+00> : vector<2x128xf32>
    %3 = tpu.matmul %1, %2, %cst {dimension_numbers = #tpu.dot_dimension_numbers<[1], [0], [0], [1], [0, 0, 1, 1], [], []>} : vector<2x1024xbf16>, vector<1024x128xbf16>, vector<2x128xf32> -> vector<2x128xf32>
    %c0_3 = arith.constant 0 : index
    %c0_4 = arith.constant 0 : index
    %4 = vector.load %arg3[%c0_3, %c0_4] : memref<1x128xf32, #tpu.memory_space<vmem>>, vector<1x128xf32>
    %5 = vector.broadcast %4 : vector<1x128xf32> to vector<2x128xf32>
    %6 = arith.addf %3, %5 : vector<2x128xf32>
    %cst_5 = arith.constant 0.000000e+00 : f32
    %7 = vector.broadcast %cst_5 : f32 to vector<2x128xf32>
    %8 = arith.maximumf %6, %7 : vector<2x128xf32>
    %9 = arith.truncf %8 : vector<2x128xf32> to vector<2x128xbf16>
    %c0_6 = arith.constant 0 : index
    %c0_7 = arith.constant 0 : index
    %10 = vector.load %arg4[%c0_6, %c0_7] : memref<128x64xbf16, #tpu.memory_space<vmem>>, vector<128x64xbf16>
    %cst_8 = arith.constant dense<0.000000e+00> : vector<2x64xf32>
    %11 = tpu.matmul %9, %10, %cst_8 {dimension_numbers = #tpu.dot_dimension_numbers<[1], [0], [0], [1], [0, 0, 1, 1], [], []>} : vector<2x128xbf16>, vector<128x64xbf16>, vector<2x64xf32> -> vector<2x64xf32>
    %c0_9 = arith.constant 0 : index
    %c0_10 = arith.constant 0 : index
    %12 = vector.load %arg5[%c0_9, %c0_10] : memref<1x64xf32, #tpu.memory_space<vmem>>, vector<1x64xf32>
    %13 = vector.broadcast %12 : vector<1x64xf32> to vector<2x64xf32>
    %14 = arith.addf %11, %13 : vector<2x64xf32>
    %15 = arith.truncf %14 : vector<2x64xf32> to vector<2x64xbf16>
    %c0_11 = arith.constant 0 : index
    %c0_12 = arith.constant 0 : index
    %16 = vector.load %arg6[%c0_11, %c0_12] : memref<64x128xbf16, #tpu.memory_space<vmem>>, vector<64x128xbf16>
    %cst_13 = arith.constant dense<0.000000e+00> : vector<2x128xf32>
    %17 = tpu.matmul %15, %16, %cst_13 {dimension_numbers = #tpu.dot_dimension_numbers<[1], [0], [0], [1], [0, 0, 1, 1], [], []>} : vector<2x64xbf16>, vector<64x128xbf16>, vector<2x128xf32> -> vector<2x128xf32>
    %c0_14 = arith.constant 0 : index
    %c0_15 = arith.constant 0 : index
    %18 = vector.load %arg7[%c0_14, %c0_15] : memref<1x128xf32, #tpu.memory_space<vmem>>, vector<1x128xf32>
    %19 = vector.broadcast %18 : vector<1x128xf32> to vector<2x128xf32>
    %20 = arith.addf %17, %19 : vector<2x128xf32>
    %cst_16 = arith.constant 0.000000e+00 : f32
    %21 = vector.broadcast %cst_16 : f32 to vector<2x128xf32>
    %22 = arith.maximumf %20, %21 : vector<2x128xf32>
    %23 = arith.truncf %22 : vector<2x128xf32> to vector<2x128xbf16>
    %c0_17 = arith.constant 0 : index
    %c0_18 = arith.constant 0 : index
    %24 = vector.load %arg8[%c0_17, %c0_18] : memref<128x1024xbf16, #tpu.memory_space<vmem>>, vector<128x1024xbf16>
    %cst_19 = arith.constant dense<0.000000e+00> : vector<2x1024xf32>
    %25 = tpu.matmul %23, %24, %cst_19 {dimension_numbers = #tpu.dot_dimension_numbers<[1], [0], [0], [1], [0, 0, 1, 1], [], []>} : vector<2x128xbf16>, vector<128x1024xbf16>, vector<2x1024xf32> -> vector<2x1024xf32>
    %c0_20 = arith.constant 0 : index
    %c0_21 = arith.constant 0 : index
    %26 = vector.load %arg9[%c0_20, %c0_21] : memref<1x1024xf32, #tpu.memory_space<vmem>>, vector<1x1024xf32>
    %27 = vector.broadcast %26 : vector<1x1024xf32> to vector<2x1024xf32>
    %28 = arith.addf %25, %27 : vector<2x1024xf32>
    %c0_22 = arith.constant 0 : index
    %c0_23 = arith.constant 0 : index
    %29 = vector.load %arg15[%c0_22, %c0_23] : memref<2x1024xf32, #tpu.memory_space<vmem>>, vector<2x1024xf32>
    tpu.vector_store %arg15[%c0_22, %c0_23], %28 {strides = array<i32>} : memref<2x1024xf32, #tpu.memory_space<vmem>>, vector<2x1024xf32>,
    %30 = arith.subf %0, %28 : vector<2x1024xf32>
    %31 = arith.mulf %30, %30 : vector<2x1024xf32>
    %cst_24 = arith.constant dense<0.000000e+00> : vector<2xf32>
    %32 = vector.multi_reduction <add>, %31, %cst_24 [1] : vector<2x1024xf32> to vector<2xf32>
    %33 = vector.shape_cast %32 : vector<2xf32> to vector<2x1xf32>
    %cst_25 = arith.constant 5.000000e-01 : f32
    %34 = vector.broadcast %cst_25 : f32 to vector<2x1xf32>
    %35 = arith.mulf %34, %33 : vector<2x1xf32>
    %cst_26 = arith.constant 940.993041 : f32
    %36 = vector.broadcast %cst_26 : f32 to vector<2x1xf32>
    %37 = arith.addf %35, %36 : vector<2x1xf32>
    %c0_27 = arith.constant 0 : index
    %c0_28 = arith.constant 0 : index
    %38 = vector.load %arg17[%c0_27, %c0_28] : memref<4x64xf32, #tpu.memory_space<vmem>>, vector<2x64xf32>
    tpu.vector_store %arg17[%c0_27, %c0_28], %14 {strides = array<i32>} : memref<4x64xf32, #tpu.memory_space<vmem>>, vector<2x64xf32>,
    %c0_29 = arith.constant 0 : index
    %c0_30 = arith.constant 0 : index
    %39 = vector.load %arg1[%c0_29, %c0_30] : memref<2x64xf32, #tpu.memory_space<vmem>>, vector<2x64xf32>
    %c2 = arith.constant 2 : index
    %c0_31 = arith.constant 0 : index
    %40 = vector.load %arg17[%c2, %c0_31] : memref<4x64xf32, #tpu.memory_space<vmem>>, vector<2x64xf32>
    tpu.vector_store %arg17[%c2, %c0_31], %39 {strides = array<i32>} : memref<4x64xf32, #tpu.memory_space<vmem>>, vector<2x64xf32>,
    %c0_32 = arith.constant 0 : index
    %c0_33 = arith.constant 0 : index
    %41 = vector.load %arg17[%c0_32, %c0_33] : memref<4x64xf32, #tpu.memory_space<vmem>>, vector<4x64xf32>
    %42 = arith.truncf %41 : vector<4x64xf32> to vector<4x64xbf16>
    %c0_34 = arith.constant 0 : index
    %c0_35 = arith.constant 0 : index
    %43 = vector.load %arg11[%c0_34, %c0_35] : memref<64x128xbf16, #tpu.memory_space<vmem>>, vector<64x128xbf16>
    %cst_36 = arith.constant dense<0.000000e+00> : vector<4x128xf32>
    %44 = tpu.matmul %42, %43, %cst_36 {dimension_numbers = #tpu.dot_dimension_numbers<[1], [0], [0], [1], [0, 0, 1, 1], [], []>} : vector<4x64xbf16>, vector<64x128xbf16>, vector<4x128xf32> -> vector<4x128xf32>
    %c0_37 = arith.constant 0 : index
    %c0_38 = arith.constant 0 : index
    %45 = vector.load %arg10[%c0_37, %c0_38] : memref<1024x128xbf16, #tpu.memory_space<vmem>>, vector<1024x128xbf16>
    %cst_39 = arith.constant dense<0.000000e+00> : vector<2x128xf32>
    %46 = tpu.matmul %1, %45, %cst_39 {dimension_numbers = #tpu.dot_dimension_numbers<[1], [0], [0], [1], [0, 0, 1, 1], [], []>} : vector<2x1024xbf16>, vector<1024x128xbf16>, vector<2x128xf32> -> vector<2x128xf32>
    %c0_40 = arith.constant 0 : index
    %c0_41 = arith.constant 0 : index
    %47 = vector.load %arg12[%c0_40, %c0_41] : memref<1x128xf32, #tpu.memory_space<vmem>>, vector<1x128xf32>
    %48 = vector.broadcast %47 : vector<1x128xf32> to vector<2x128xf32>
    %49 = arith.addf %46, %48 : vector<2x128xf32>
    %c0_42 = arith.constant 0 : index
    %c0_43 = arith.constant 0 : index
    %50 = vector.load %arg18[%c0_42, %c0_43] : memref<4x128xf32, #tpu.memory_space<vmem>>, vector<2x128xf32>
    tpu.vector_store %arg18[%c0_42, %c0_43], %49 {strides = array<i32>} : memref<4x128xf32, #tpu.memory_space<vmem>>, vector<2x128xf32>,
    %c2_44 = arith.constant 2 : index
    %c0_45 = arith.constant 0 : index
    %51 = vector.load %arg18[%c2_44, %c0_45] : memref<4x128xf32, #tpu.memory_space<vmem>>, vector<2x128xf32>
    tpu.vector_store %arg18[%c2_44, %c0_45], %49 {strides = array<i32>} : memref<4x128xf32, #tpu.memory_space<vmem>>, vector<2x128xf32>,
    %c0_46 = arith.constant 0 : index
    %c0_47 = arith.constant 0 : index
    %52 = vector.load %arg18[%c0_46, %c0_47] : memref<4x128xf32, #tpu.memory_space<vmem>>, vector<4x128xf32>
    %53 = arith.addf %52, %44 : vector<4x128xf32>
    %cst_48 = arith.constant 0.000000e+00 : f32
    %54 = vector.broadcast %cst_48 : f32 to vector<4x128xf32>
    %55 = arith.maximumf %53, %54 : vector<4x128xf32>
    %56 = arith.truncf %55 : vector<4x128xf32> to vector<4x128xbf16>
    %c0_49 = arith.constant 0 : index
    %c0_50 = arith.constant 0 : index
    %57 = vector.load %arg13[%c0_49, %c0_50] : memref<128x1xbf16, #tpu.memory_space<vmem>>, vector<128x1xbf16>
    %cst_51 = arith.constant dense<0.000000e+00> : vector<4x1xf32>
    %58 = tpu.matmul %56, %57, %cst_51 {dimension_numbers = #tpu.dot_dimension_numbers<[1], [0], [0], [1], [0, 0, 1, 1], [], []>} : vector<4x128xbf16>, vector<128x1xbf16>, vector<4x1xf32> -> vector<4x1xf32>
    %c0_52 = arith.constant 0 : index
    %c0_53 = arith.constant 0 : index
    %59 = vector.load %arg14[%c0_52, %c0_53] : memref<1x1xf32, #tpu.memory_space<vmem>>, vector<1x1xf32>
    %60 = vector.broadcast %59 : vector<1x1xf32> to vector<4x1xf32>
    %61 = arith.addf %58, %60 : vector<4x1xf32>
    %62 = vector.extract_strided_slice %61 {offsets = [0, 0], sizes = [2, 1], strides = [1, 1]} : vector<4x1xf32> to vector<2x1xf32>
    %63 = vector.extract_strided_slice %61 {offsets = [2, 0], sizes = [2, 1], strides = [1, 1]} : vector<4x1xf32> to vector<2x1xf32>
    %cst_54 = arith.constant 0.000000e+00 : f32
    %64 = vector.broadcast %cst_54 : f32 to vector<2x1xf32>
    %65 = arith.subf %64, %62 : vector<2x1xf32>
    %cst_55 = arith.constant 0.000000e+00 : f32
    %66 = vector.broadcast %cst_55 : f32 to vector<2x1xf32>
    %67 = arith.maximumf %65, %66 : vector<2x1xf32>
    %68 = math.absf %65 : vector<2x1xf32>
    %cst_56 = arith.constant 0.000000e+00 : f32
    %69 = vector.broadcast %cst_56 : f32 to vector<2x1xf32>
    %70 = arith.subf %69, %68 : vector<2x1xf32>
    %71 = math.exp %70 : vector<2x1xf32>
    %72 = math.log1p %71 : vector<2x1xf32>
    %73 = arith.addf %67, %72 : vector<2x1xf32>
    %cst_57 = arith.constant 0.000000e+00 : f32
    %74 = vector.broadcast %cst_57 : f32 to vector<2x1xf32>
    %75 = arith.maximumf %63, %74 : vector<2x1xf32>
    %76 = math.absf %63 : vector<2x1xf32>
    %cst_58 = arith.constant 0.000000e+00 : f32
    %77 = vector.broadcast %cst_58 : f32 to vector<2x1xf32>
    %78 = arith.subf %77, %76 : vector<2x1xf32>
    %79 = math.exp %78 : vector<2x1xf32>
    %80 = math.log1p %79 : vector<2x1xf32>
    %81 = arith.addf %75, %80 : vector<2x1xf32>
    %82 = arith.addf %73, %81 : vector<2x1xf32>
    %83 = vector.shape_cast %82 : vector<2x1xf32> to vector<1x2x1xf32>
    %cst_59 = arith.constant dense<0.000000e+00> : vector<1xf32>
    %84 = vector.multi_reduction <add>, %83, %cst_59 [1, 2] : vector<1x2x1xf32> to vector<1xf32>
    %85 = vector.shape_cast %84 : vector<1xf32> to vector<1x1x1xf32>
    %86 = vector.extract %85[0, 0, 0] : f32 from vector<1x1x1xf32>
    %87 = vector.broadcast %86 : f32 to vector<1x1xf32>
    %cst_60 = arith.constant 2.000000e+00 : f32
    %88 = vector.broadcast %cst_60 : f32 to vector<1x1xf32>
    %89 = arith.divf %87, %88 : vector<1x1xf32>
    %90 = tpu.iota {dimensions = array<i32: 1>} : vector<2x128xi32>
    %c0_i32 = arith.constant 0 : i32
    %91 = vector.broadcast %c0_i32 : i32 to vector<2x128xi32>
    %92 = arith.cmpi eq, %90, %91 : vector<2x128xi32>
    %cst_61 = arith.constant 0.000000e+00 : f32
    %93 = vector.shape_cast %37 : vector<2x1xf32> to vector<2x1xf32>
    %94 = vector.broadcast %93 : vector<2x1xf32> to vector<2x128xf32>
    %95 = vector.broadcast %cst_61 : f32 to vector<2x128xf32>
    %96 = arith.select %92, %94, %95 : vector<2x128xi1>, vector<2x128xf32>
    %c1_i32 = arith.constant 1 : i32
    %97 = vector.broadcast %c1_i32 : i32 to vector<2x128xi32>
    %98 = arith.cmpi eq, %90, %97 : vector<2x128xi32>
    %cst_62 = arith.constant 0.000000e+00 : f32
    %99 = vector.shape_cast %62 : vector<2x1xf32> to vector<2x1xf32>
    %100 = vector.broadcast %99 : vector<2x1xf32> to vector<2x128xf32>
    %101 = vector.broadcast %cst_62 : f32 to vector<2x128xf32>
    %102 = arith.select %98, %100, %101 : vector<2x128xi1>, vector<2x128xf32>
    %103 = arith.addf %96, %102 : vector<2x128xf32>
    %c2_i32 = arith.constant 2 : i32
    %104 = vector.broadcast %c2_i32 : i32 to vector<2x128xi32>
    %105 = arith.cmpi eq, %90, %104 : vector<2x128xi32>
    %cst_63 = arith.constant 0.000000e+00 : f32
    %106 = vector.shape_cast %89 : vector<1x1xf32> to vector<1x1xf32>
    %107 = vector.broadcast %106 : vector<1x1xf32> to vector<2x128xf32>
    %108 = vector.broadcast %cst_63 : f32 to vector<2x128xf32>
    %109 = arith.select %105, %107, %108 : vector<2x128xi1>, vector<2x128xf32>
    %110 = arith.addf %103, %109 : vector<2x128xf32>
    %c0_64 = arith.constant 0 : index
    %c0_65 = arith.constant 0 : index
    %111 = vector.load %arg16[%c0_64, %c0_65] : memref<2x128xf32, #tpu.memory_space<vmem>>, vector<2x128xf32>
    tpu.vector_store %arg16[%c0_64, %c0_65], %110 {strides = array<i32>} : memref<2x128xf32, #tpu.memory_space<vmem>>, vector<2x128xf32>,
    return
  }
}

</mosaic_0001>

<bundles_post_ra>
// kernel: avae_forward.1
= control target key start
LH: loop header
LB: loop body
LE: loop exit
PB: predicated region body
PF: predicated region fallthrough
CT: control target
= control target key end

     0   :  { %s3782_s0 = inlined_call_operand.vmem [shape: f32[2,1024], index: 0, kind: input, shape index: {}]   ;;  %s3783_s1 = inlined_call_operand.vmem [shape: f32[2,64], index: 1, kind: input, shape index: {}]   ;;  %s3784_s2 = inlined_call_operand.hbm [shape: bf16[1024,128], index: 2, kind: input, shape index: {}]   ;;  %s3785_s3 = inlined_call_operand.vmem [shape: f32[1,128], index: 3, kind: input, shape index: {}]   ;;  %s3786_s4 = inlined_call_operand.vmem [shape: bf16[128,64], index: 4, kind: input, shape index: {}]   ;;  %s3787_s5 = inlined_call_operand.vmem [shape: f32[1,64], index: 5, kind: input, shape index: {}]   ;;  %s3788_s6 = inlined_call_operand.vmem [shape: bf16[64,128], index: 6, kind: input, shape index: {}]   ;;  %s3789_s7 = inlined_call_operand.vmem [shape: f32[1,128], index: 7, kind: input, shape index: {}]   ;;  %s3790_s8 = inlined_call_operand.hbm [shape: bf16[128,1024], index: 8, kind: input, shape index: {}]   ;;  %s3791_s9 = inlined_call_operand.vmem [shape: f32[1,1024], index: 9, kind: input, shape index: {}]   ;;  %s3792_s10 = inlined_call_operand.hbm [shape: bf16[1024,128], index: 10, kind: input, shape index: {}]   ;;  %s3793_s11 = inlined_call_operand.vmem [shape: bf16[64,128], index: 11, kind: input, shape index: {}]   ;;  %s3794_s12 = inlined_call_operand.vmem [shape: f32[1,128], index: 12, kind: input, shape index: {}]   ;;  %s3795_s13 = inlined_call_operand.vmem [shape: bf16[128,1], index: 13, kind: input, shape index: {}]   ;;  %s3796_s14 = inlined_call_operand.<no memory space> [shape: f32[1,1], index: 14, kind: input, shape index: {}]   ;;  %s3797_s15 = inlined_call_operand.vmem [shape: f32[2,1024], index: 15, kind: output, shape index: {0}]   ;;  %s3798_s16 = inlined_call_operand.vmem [shape: f32[2,128], index: 16, kind: output, shape index: {1}]  }
   0x1   :  { %3800 = sst [smem:[#allocation12_spill]] %s3782_s0  ;;  %v22_v0 = vstv %s3796_s14 }
   0x2   :  { %23 = vst [vmem:[#allocation4] sm:$0x1] %v22_v0 }
   0x3   :  { %24 = vsyncpa [#allocation6], 0 }
   0x4   :  { %25 = vsyncpa [#allocation8], 0  ;;  %s3424_s23 = smov [#allocation7]   ;;  %s3354_s27 = scalar_lea.hbm %s3790_s8, 8192 }
   0x5   :  { %s57_s24 = sshll.u32 %s3424_s23, 4  ;;  %p3355_p0 = scmp.ne.s32.totalorder %s3790_s8, %s3354_s27  ;;  %s58_s24 = int_to_ptr.vmem [resolvable:$true] %s57_s24 }
   0x6   :  { %p3358_p1 = scmp.lt.u32.totalorder %s3354_s27, %s3790_s8 }
   0x8   :  { %p3360_p2 = pnand %p3358_p1, %p3355_p0 }
   0xa   :  { %3363 = shalt.err (!%p3360_p2)
}
   0xb   :  { %s3364_s14 = scalar_lea.vmem %s58_s24, 8192  ;;  %p3369_p4 = scmp.lt.s32.totalorder %s58_s24, %s58_s24 }
   0xc   :  { %p3365_p3 = scmp.ne.s32.totalorder %s58_s24, %s3364_s14  ;;  %p3370_p5 = scmp.lt.s32.totalorder %s3364_s14, %s3364_s14 }
   0xe   :  { %p3371_p6 = por %p3370_p5, %p3369_p4 }
  0x10   :  { %p3372_p7 = pnand %p3371_p6, %p3365_p3 }
  0x12   :  { %3375 = shalt.err (!%p3372_p7)
}
  0x13   :  { %s3425_s17 = smov 512   ;;  %s3426_s18 = smov 32  }
  0x14   :  { %63 = dma.hbm_to_vmem [thread:$0]  %s3790_s8, 8192, %s58_s24, [#allocation8], %s3425_s17, %s3425_s17, %s3426_s18  }
  0x15   :  { %s3427_s21 = smov [#allocation5]   ;;  %s3376_s26 = scalar_lea.hbm %s3784_s2, 8192 }
  0x16   :  { %s35_s22 = sshll.u32 %s3427_s21, 4  ;;  %p3377_p8 = scmp.ne.s32.totalorder %s3784_s2, %s3376_s26  ;;  %s36_s22 = int_to_ptr.vmem [resolvable:$true] %s35_s22 }
  0x17   :  { %p3380_p9 = scmp.lt.u32.totalorder %s3376_s26, %s3784_s2 }
  0x19   :  { %p3382_p10 = pnand %p3380_p9, %p3377_p8 }
  0x1b   :  { %3385 = shalt.err (!%p3382_p10)
}
  0x1c   :  { %s3386_s0 = scalar_lea.vmem %s36_s22, 8192  ;;  %p3391_p12 = scmp.lt.s32.totalorder %s36_s22, %s36_s22 }
  0x1d   :  { %p3387_p11 = scmp.ne.s32.totalorder %s36_s22, %s3386_s0  ;;  %p3392_p13 = scmp.lt.s32.totalorder %s3386_s0, %s3386_s0 }
  0x1f   :  { %p3393_p0 = por %p3392_p13, %p3391_p12 }
  0x21   :  { %p3394_p1 = pnand %p3393_p0, %p3387_p11 }
  0x23   :  { %3397 = shalt.err (!%p3394_p1)
}
  0x24   :  { %s3428_s8 = smov 64   ;;  %s3429_s24 = smov 4  }
  0x25   :  { %41 = dma.hbm_to_vmem [thread:$0]  %s3784_s2, 8192, %s36_s22, [#allocation6], %s3428_s8, %s3428_s8, %s3429_s24  }
  0x26   :  { %s3430_s18 = smov [#allocation9]   ;;  %s3398_s23 = scalar_lea.hbm %s3792_s10, 8192 }
  0x27   :  { %s71_s19 = sshll.u32 %s3430_s18, 4  ;;  %p3399_p2 = scmp.ne.s32.totalorder %s3792_s10, %s3398_s23  ;;  %s72_s19 = int_to_ptr.vmem [resolvable:$true] %s71_s19 }
  0x28   :  { %p3402_p3 = scmp.lt.u32.totalorder %s3398_s23, %s3792_s10 }
  0x2a   :  { %p3404_p4 = pnand %p3402_p3, %p3399_p2 }
  0x2c   :  { %3407 = shalt.err (!%p3404_p4)
}
  0x2d   :  { %s3408_s29 = scalar_lea.vmem %s72_s19, 8192  ;;  %p3413_p6 = scmp.lt.s32.totalorder %s72_s19, %s72_s19 }
  0x2e   :  { %p3409_p5 = scmp.ne.s32.totalorder %s72_s19, %s3408_s29  ;;  %p3414_p7 = scmp.lt.s32.totalorder %s3408_s29, %s3408_s29 }
  0x30   :  { %p3415_p8 = por %p3414_p7, %p3413_p6 }
  0x32   :  { %p3416_p9 = pnand %p3415_p8, %p3409_p5 }
  0x34   :  { %3419 = shalt.err (!%p3416_p9)
}
  0x35   :  { %77 = dma.hbm_to_vmem [thread:$0]  %s3792_s10, 8192, %s72_s19, [#allocation8], %s3428_s8, %s3428_s8, %s3429_s24  }
  0x36   :  { %3420 = dma.done.wait [#allocation6], 8192  }
  0x37   :  { %3421 = vsyncadd [#allocation6], 4294959104 }
  0x38   :  { %3422 = dma.done.wait [#allocation8], 16384  }
  0x39   :  { %3423 = vsyncadd [#allocation8], 4294950912  ;;  %v3190_v1 = vld [vmem:[#allocation5 + $0x40] sm:$0xff]   ;;  %v3194_v5 = vld [vmem:[#allocation5 + $0x48] sm:$0xff]   ;;  %v3431_v23 = vmov 1983009808   ;;  %v104_v25 = vlaneseq }
  0x3a   :  { %v3191_v2 = vld [vmem:[#allocation5 + $0xc0] sm:$0xff]   ;;  %2907 = vmatprep.subr.bf16.mxu0 %v3190_v1  ;;  %v3195_v6 = vld [vmem:[#allocation5 + $0xc8] sm:$0xff]   ;;  %v3198_v9 = vld [vmem:[#allocation5 + $0x50] sm:$0xff]   ;;  %v102_v24 = vunpack.c.l.s4 %v3431_v23  ;;  %s3801_s0 = sld [smem:[#allocation12_spill]]  ;;  %vm3433_vm0 = vmmov 0   ;;  %vm1732_vm1 = vcmask 517120  }
  0x3b   :  { %v3192_v3 = vld [vmem:[#allocation5] sm:$0xff]   ;;  %2929 = vmatprep.subr.bf16.mxu1 %v3191_v2  ;;  %v3196_v7 = vld [vmem:[#allocation5 + $0x8] sm:$0xff]   ;;  %v3199_v10 = vld [vmem:[#allocation5 + $0xd0] sm:$0xff]   ;;  %v3560_v31 = vshrl.u32 %v104_v25, 7  ;;  %vm982_vm2 = vcmask 523264   ;;  %vm1712_vm3 = vcmask 1041408  }
  0x3c   :  { %v3193_v4 = vld [vmem:[#allocation5 + $0x80] sm:$0xff]   ;;  %2908 = vmatpush3.bf16.msra.mxu0 %v3192_v3  ;;  %v3197_v8 = vld [vmem:[#allocation5 + $0x88] sm:$0xff]   ;;  %v3200_v11 = vld [vmem:[#allocation5 + $0x10] sm:$0xff]   ;;  %v103_v30 = vunpack.c.0.s8 %v102_v24  ;;  %vm2644_vm6 = vcmask 1024  }
  0x3d   :  { %2930 = vmatpush3.bf16.msra.mxu1 %v3193_v4  ;;  %2909 = vmatprep.subr.bf16.mxu0 %v3194_v5  ;;  %v3201_v12 = vld [vmem:[#allocation5 + $0x90] sm:$0xff]   ;;  %v3202_v13 = vld [vmem:[#allocation5 + $0x58] sm:$0xff]   ;;  %v3206_v17 = vld [vmem:[#allocation5 + $0x60] sm:$0xff]  }
  0x3e   :  { %2931 = vmatprep.subr.bf16.mxu1 %v3195_v6  ;;  %v3203_v14 = vld [vmem:[#allocation5 + $0xd8] sm:$0xff]   ;;  %v3207_v18 = vld [vmem:[#allocation5 + $0xe0] sm:$0xff]   ;;  %v3210_v21 = vld [vmem:[#allocation5 + $0x68] sm:$0xff]   ;;  %v3563_v36 = vsub.s32 %v103_v30, %v3560_v31 }
  0x3f   :  { %v3204_v15 = vld [vmem:[#allocation5 + $0x18] sm:$0xff]   ;;  %v3208_v19 = vld [vmem:[#allocation5 + $0x20] sm:$0xff]   ;;  %v3211_v22 = vld [vmem:[#allocation5 + $0xe8] sm:$0xff]  }
  0x40   :  { %2910 = vmatpush3.bf16.msra.mxu0 %v3196_v7  ;;  %v3205_v16 = vld [vmem:[#allocation5 + $0x98] sm:$0xff]   ;;  %v3209_v20 = vld [vmem:[#allocation5 + $0xa0] sm:$0xff]   ;;  %v3212_v26 = vld [vmem:[#allocation5 + $0x28] sm:$0xff]  }
  0x41   :  { %2932 = vmatpush3.bf16.msra.mxu1 %v3197_v8  ;;  %2911 = vmatprep.subr.bf16.mxu0 %v3198_v9  ;;  %v3213_v27 = vld [vmem:[#allocation5 + $0xa8] sm:$0xff]   ;;  %v3214_v28 = vld [vmem:[#allocation5 + $0x70] sm:$0xff]   ;;  %v3218_v34 = vld [vmem:[#allocation5 + $0x78] sm:$0xff]  }
  0x42   :  { %2933 = vmatprep.subr.bf16.mxu1 %v3199_v10  ;;  %v3215_v29 = vld [vmem:[#allocation5 + $0xf0] sm:$0xff]   ;;  %v3219_v35 = vld [vmem:[#allocation5 + $0xf8] sm:$0xff]   ;;  %v3223_v42 = vld [vmem:[#allocation5 + $0x140] sm:$0xff]  }
  0x43   :  { %v3216_v32 = vld [vmem:[#allocation5 + $0x30] sm:$0xff]   ;;  %v3220_v37 = vld [vmem:[#allocation5 + $0x38] sm:$0xff]   ;;  %v3224_v43 = vld [vmem:[#allocation5 + $0x1c0] sm:$0xff]  }
  0x44   :  { %2912 = vmatpush3.bf16.msra.mxu0 %v3200_v11  ;;  %v3217_v33 = vld [vmem:[#allocation5 + $0xb0] sm:$0xff]   ;;  %v3221_v38 = vld [vmem:[#allocation5 + $0xb8] sm:$0xff]   ;;  %v3225_v47 = vld [vmem:[#allocation5 + $0x100] sm:$0xff]  }
  0x45   :  { %2934 = vmatpush3.bf16.msra.mxu1 %v3201_v12  ;;  %2913 = vmatprep.subr.bf16.mxu0 %v3202_v13  ;;  %v96_v39 = vld [vmem:[%s3801_s0] sm:$0xff]  ;;  %v3226_v50 = vld [vmem:[#allocation5 + $0x180] sm:$0xff]   ;;  %v3227_v52 = vld [vmem:[#allocation5 + $0x148] sm:$0xff]  }
  0x46   :  { %2935 = vmatprep.subr.bf16.mxu1 %v3203_v14  ;;  %v107_v40 = vrot.slane %v96_v39, %v3563_v36  ;;  %v100_v41 = vcombine.high %v96_v39, %v96_v39  ;;  %v3228_v54 = vld [vmem:[#allocation5 + $0x1c8] sm:$0xff]   ;;  %v3231_v57 = vld [vmem:[#allocation5 + $0x150] sm:$0xff]   ;;  %v3235_v61 = vld [vmem:[#allocation5 + $0x158] sm:$0xff]  }
  0x47   :  { %v3229_v55 = vld [vmem:[#allocation5 + $0x108] sm:$0xff]   ;;  %v3232_v58 = vld [vmem:[#allocation5 + $0x1d0] sm:$0xff]   ;;  %v3236_v62 = vld [vmem:[#allocation5 + $0x1d8] sm:$0xff]  }
  0x48   :  { %2914 = vmatpush3.bf16.msra.mxu0 %v3204_v15  ;;  %v115_v44 = vcombine.high %v107_v40, %v107_v40  ;;  %v114_v45 = vrot.slane %v100_v41, %v3563_v36  ;;  %v3570_v46 = vpack.c.bf16 %v107_v40, %v107_v40  ;;  %v3230_v56 = vld [vmem:[#allocation5 + $0x188] sm:$0xff]   ;;  %v3233_v59 = vld [vmem:[#allocation5 + $0x110] sm:$0xff]   ;;  %v3237_v63 = vld [vmem:[#allocation5 + $0x118] sm:$0xff]  }
  0x49   :  { %2936 = vmatpush3.bf16.msra.mxu1 %v3205_v16  ;;  %2915 = vmatprep.subr.bf16.mxu0 %v3206_v17  ;;  %v3234_v60 = vld [vmem:[#allocation5 + $0x190] sm:$0xff]   ;;  %v3238_v0 = vld [vmem:[#allocation5 + $0x198] sm:$0xff]   ;;  %v3239_v1 = vld [vmem:[#allocation5 + $0x160] sm:$0xff]  }
  0x4a   :  { %2937 = vmatprep.subr.bf16.mxu1 %v3207_v18  ;;  %v3572_v48 = vpack.c.bf16 %v115_v44, %v115_v44  ;;  %v116_v49 = vcombine.high %v114_v45, %v114_v45  ;;  %v3574_v51 = vpack.c.bf16 %v114_v45, %v114_v45  ;;  %v3240_v2 = vld [vmem:[#allocation5 + $0x1e0] sm:$0xff]   ;;  %v3243_v5 = vld [vmem:[#allocation5 + $0x168] sm:$0xff]   ;;  %v3247_v9 = vld [vmem:[#allocation5 + $0x170] sm:$0xff]  }
  0x4b   :  { %v3241_v3 = vld [vmem:[#allocation5 + $0x120] sm:$0xff]   ;;  %v3244_v6 = vld [vmem:[#allocation5 + $0x1e8] sm:$0xff]   ;;  %v3248_v10 = vld [vmem:[#allocation5 + $0x1f0] sm:$0xff]  }
  0x4c   :  { %2916 = vmatpush3.bf16.msra.mxu0 %v3208_v19  ;;  %701 = vmatprep.mubr.bf16.mxu0 %v3572_v48  ;;  %v3577_v53 = vpack.c.bf16 %v116_v49, %v116_v49  ;;  %v3242_v4 = vld [vmem:[#allocation5 + $0x1a0] sm:$0xff]   ;;  %v3245_v7 = vld [vmem:[#allocation5 + $0x128] sm:$0xff]   ;;  %v3249_v11 = vld [vmem:[#allocation5 + $0x130] sm:$0xff]  }
  0x4d   :  { %2938 = vmatpush3.bf16.msra.mxu1 %v3209_v20  ;;  %2917 = vmatprep.subr.bf16.mxu0 %v3210_v21  ;;  %v3246_v8 = vld [vmem:[#allocation5 + $0x1a8] sm:$0xff]   ;;  %v3250_v12 = vld [vmem:[#allocation5 + $0x1b0] sm:$0xff]   ;;  %v3251_v13 = vld [vmem:[#allocation5 + $0x178] sm:$0xff]  }
  0x4e   :  { %2939 = vmatprep.subr.bf16.mxu1 %v3211_v22  ;;  %741 = vmatprep.mubr.bf16.mxu1 %v3577_v53  ;;  %v3252_v14 = vld [vmem:[#allocation5 + $0x1f8] sm:$0xff]   ;;  %v3266_v41 = vld [vmem:[%s3788_s6 + $0x10] sm:$0xff]  }
  0x4f   :  { %v3253_v15 = vld [vmem:[#allocation5 + $0x138] sm:$0xff]  }
  0x50   :  { %2918 = vmatpush3.bf16.msra.mxu0 %v3212_v26  ;;  %v97_v16 = vld [vmem:[%s3801_s0 + $0x8] sm:$0xff]  ;;  %v3264_v39 = vld [vmem:[%s3788_s6] sm:$0xff]  }
  0x51   :  { %2940 = vmatpush3.bf16.msra.mxu1 %v3213_v27  ;;  %2919 = vmatprep.subr.bf16.mxu0 %v3214_v28  ;;  %v3254_v17 = vld [vmem:[#allocation5 + $0x1b8] sm:$0xff]   ;;  %v124_v18 = vrot.slane %v97_v16, %v3563_v36  ;;  %v117_v19 = vcombine.high %v97_v16, %v97_v16  ;;  %v1033_v16 = vld [vmem:[#allocation7 + $0x28] sm:$0xff] }
  0x52   :  { %2941 = vmatprep.subr.bf16.mxu1 %v3215_v29  ;;  %v3256_v28 = vld [vmem:[%s3786_s4] sm:$0xff]   ;;  %v3432_v29 = vmov 0.0   ;;  %v3257_v30 = vld [vmem:[%s3786_s4 + $0x8] sm:$0xff]  }
  0x53   :  { %v132_v20 = vcombine.high %v124_v18, %v124_v18  ;;  %v131_v21 = vrot.slane %v117_v19, %v3563_v36  ;;  %v3587_v22 = vpack.c.bf16 %v124_v18, %v124_v18  ;;  %v3265_v40 = vld [vmem:[%s3788_s6 + $0x8] sm:$0xff]   ;;  %v1037_v19 = vld [vmem:[#allocation7 + $0x48] sm:$0xff] }
  0x54   :  { %2920 = vmatpush3.bf16.msra.mxu0 %v3216_v32  ;;  %v3258_v32 = vld [vmem:[%s3786_s4 + $0x10] sm:$0xff]  }
  0x55   :  { %2942 = vmatpush3.bf16.msra.mxu1 %v3217_v33  ;;  %2921 = vmatprep.subr.bf16.mxu0 %v3218_v34  ;;  %v3589_v23 = vpack.c.bf16 %v132_v20, %v132_v20  ;;  %v133_v24 = vcombine.high %v131_v21, %v131_v21  ;;  %v3591_v26 = vpack.c.bf16 %v131_v21, %v131_v21  ;;  %v3259_v33 = vld [vmem:[%s3786_s4 + $0x18] sm:$0xff]   ;;  %v3260_v34 = vld [vmem:[%s3786_s4 + $0x20] sm:$0xff]  }
  0x56   :  { %2943 = vmatprep.subr.bf16.mxu1 %v3219_v35  ;;  %v3261_v35 = vld [vmem:[%s3786_s4 + $0x28] sm:$0xff]   ;;  %v1041_v20 = vld [vmem:[#allocation7 + $0x68] sm:$0xff] }
  0x57   :  { %v3594_v27 = vpack.c.bf16 %v133_v24, %v133_v24  ;;  %v2775_v21 = vcombine.high %v1037_v19, %v1041_v20  ;;  %v2774_v24 = vcombine.low %v1037_v19, %v1041_v20 }
  0x58   :  { %2922 = vmatpush3.bf16.msra.mxu0 %v3220_v37  ;;  %v3262_v37 = vld [vmem:[%s3786_s4 + $0x30] sm:$0xff]  }
  0x59   :  { %2944 = vmatpush3.bf16.msra.mxu1 %v3221_v38  ;;  %2951 = vmatprep.subr.bf16.mxu0 %v3223_v42  ;;  %v3263_v38 = vld [vmem:[%s3786_s4 + $0x38] sm:$0xff]  }
  0x5a   :  { %2973 = vmatprep.subr.bf16.mxu1 %v3224_v43  ;;  %v2684_v43 = vld [vmem:[%s3785_s3] ss:$0 sm:$0xff] }
  0x5b   :  { %702 = vmatmul.mubr.bf16.vlgmr.msra.gmra.mrb[0].mxu0 %v3570_v46 }
  0x5c   :  { %2952 = vmatpush3.bf16.msra.mxu0 %v3225_v47  ;;  %742 = vmatmul.mubr.bf16.vlgmr.msra.gmra.mrb[0].mxu1 %v3574_v51 }
  0x5d   :  { %2953 = vmatprep.subr.bf16.mxu0 %v3227_v52  ;;  %2974 = vmatpush3.bf16.msra.mxu1 %v3226_v50 }
  0x5e   :  { %2975 = vmatprep.subr.bf16.mxu1 %v3228_v54  ;;  %781 = vmatprep.mubr.bf16.mxu0 %v3589_v23 }
  0x5f   :  { %821 = vmatprep.mubr.bf16.mxu1 %v3594_v27 }
  0x60   :  { %2954 = vmatpush3.bf16.msra.mxu0 %v3229_v55 }
  0x61   :  { %2955 = vmatprep.subr.bf16.mxu0 %v3231_v57  ;;  %2976 = vmatpush3.bf16.msra.mxu1 %v3230_v56 }
  0x62   :  { %2977 = vmatprep.subr.bf16.mxu1 %v3232_v58 }
  0x64   :  { %2956 = vmatpush3.bf16.msra.mxu0 %v3233_v59 }
  0x65   :  { %2957 = vmatprep.subr.bf16.mxu0 %v3235_v61  ;;  %2978 = vmatpush3.bf16.msra.mxu1 %v3234_v60 }
  0x66   :  { %2979 = vmatprep.subr.bf16.mxu1 %v3236_v62 }
  0x68   :  { %2958 = vmatpush3.bf16.msra.mxu0 %v3237_v63 }
  0x69   :  { %2959 = vmatprep.subr.bf16.mxu0 %v3239_v1  ;;  %2980 = vmatpush3.bf16.msra.mxu1 %v3238_v0 }
  0x6a   :  { %2981 = vmatprep.subr.bf16.mxu1 %v3240_v2 }
  0x6c   :  { %2960 = vmatpush3.bf16.msra.mxu0 %v3241_v3 }
  0x6d   :  { %2961 = vmatprep.subr.bf16.mxu0 %v3243_v5  ;;  %2982 = vmatpush3.bf16.msra.mxu1 %v3242_v4 }
  0x6e   :  { %2983 = vmatprep.subr.bf16.mxu1 %v3244_v6 }
  0x70   :  { %2962 = vmatpush3.bf16.msra.mxu0 %v3245_v7 }
  0x71   :  { %2963 = vmatprep.subr.bf16.mxu0 %v3247_v9  ;;  %2984 = vmatpush3.bf16.msra.mxu1 %v3246_v8  ;;  %v3267_v9 = vld [vmem:[%s3788_s6 + $0x18] sm:$0xff]  }
  0x72   :  { %2985 = vmatprep.subr.bf16.mxu1 %v3248_v10  ;;  %v1734_v10 = vld [vmem:[%s3783_s1] sm:$0x3] }
  0x73   :  { %1735 = vst.msk [vmem:[#allocation2 + $0x2] sm:$0x3] %vm1732_vm1, %v1734_v10  ;;  %v1064_v10 = vld [vmem:[#allocation7 + $0x120] sm:$0xff] }
  0x74   :  { %2964 = vmatpush3.bf16.msra.mxu0 %v3249_v11  ;;  %v1028_v11 = vld [vmem:[#allocation7] sm:$0xff] }
  0x75   :  { %2965 = vmatprep.subr.bf16.mxu0 %v3251_v13  ;;  %2986 = vmatpush3.bf16.msra.mxu1 %v3250_v12  ;;  %v1032_v12 = vld [vmem:[#allocation7 + $0x20] sm:$0xff]  ;;  %v1029_v13 = vld [vmem:[#allocation7 + $0x8] sm:$0xff] }
  0x76   :  { %2987 = vmatprep.subr.bf16.mxu1 %v3252_v14  ;;  %v2764_v14 = vcombine.low %v1028_v11, %v1032_v12  ;;  %v2767_v18 = vcombine.high %v1029_v13, %v1033_v16 }
  0x78   :  { %2966 = vmatpush3.bf16.msra.mxu0 %v3253_v15  ;;  %v2765_v15 = vcombine.high %v1028_v11, %v1032_v12 }
  0x79   :  { %2988 = vmatpush3.bf16.msra.mxu1 %v3254_v17  ;;  %3111 = vmatprep.subr.bf16.mxu0 %v3432_v29  ;;  %v2766_v17 = vcombine.low %v1029_v13, %v1033_v16  ;;  %v1068_v13 = vld [vmem:[#allocation7 + $0x140] sm:$0xff] }
  0x7a   :  { %3131 = vmatprep.subr.bf16.mxu1 %v3432_v29 }
  0x7b   :  { %782 = vmatmul.mubr.bf16.vlgmr.msra.gmra.mrb[4].mxu0 %v3587_v22 }
  0x7c   :  { %822 = vmatmul.mubr.bf16.vlgmr.msra.gmra.mrb[4].mxu1 %v3591_v26  ;;  %3112 = vmatpush3.bf16.msra.mxu0 %v3256_v28  ;;  %v1045_v28 = vld [vmem:[#allocation7 + $0x88] sm:$0xff] }
  0x7d   :  { %3113 = vmatprep.subr.bf16.mxu0 %v3432_v29  ;;  %3127 = vmatprep.mubr.msk.bf16.mxu0 %vm3433_vm0, %v3432_v29 }
  0x7e   :  { %3139 = vmatprep.mubr.msk.bf16.mxu1 %vm3433_vm0, %v3432_v29  ;;  %3132 = vmatpush3.bf16.msra.mxu1 %v3264_v39  ;;  %v1061_v39 = vld [vmem:[#allocation7 + $0x108] sm:$0xff] }
  0x7f   :  { %3133 = vmatprep.subr.bf16.mxu1 %v3432_v29 }
  0x80   :  { %3114 = vmatpush3.bf16.msra.mxu0 %v3257_v30  ;;  %v1049_v30 = vld [vmem:[#allocation7 + $0xa8] sm:$0xff] }
  0x81   :  { %3115 = vmatprep.subr.bf16.mxu0 %v3432_v29 }
  0x82   :  { %3134 = vmatpush3.bf16.msra.mxu1 %v3265_v40  ;;  %v1065_v40 = vld [vmem:[#allocation7 + $0x128] sm:$0xff] }
  0x83   :  { %3135 = vmatprep.subr.bf16.mxu1 %v3432_v29 }
  0x84   :  { %3116 = vmatpush3.bf16.msra.mxu0 %v3258_v32  ;;  %v2783_v32 = vcombine.high %v1045_v28, %v1049_v30 }
  0x85   :  { %3117 = vmatprep.subr.bf16.mxu0 %v3432_v29 }
  0x86   :  { %3136 = vmatpush3.bf16.msra.mxu1 %v3266_v41  ;;  %v2799_v41 = vcombine.high %v1061_v39, %v1065_v40 }
  0x87   :  { %3137 = vmatprep.subr.bf16.mxu1 %v3432_v29 }
  0x88   :  { %3118 = vmatpush3.bf16.msra.mxu0 %v3259_v33  ;;  %v2782_v33 = vcombine.low %v1045_v28, %v1049_v30  ;;  %v1088_v28 = vld [vmem:[#allocation7 + $0x1e0] sm:$0xff]  ;;  %v1085_v30 = vld [vmem:[#allocation7 + $0x1c8] sm:$0xff] }
  0x89   :  { %3119 = vmatprep.subr.bf16.mxu0 %v3432_v29 }
  0x8a   :  { %3138 = vmatpush3.bf16.msra.mxu1 %v3267_v9  ;;  %v1060_v9 = vld [vmem:[#allocation7 + $0x100] sm:$0xff] }
  0x8b   :  { %1454 = vmatprep.subr.bf16.mxu1 %v2765_v15  ;;  %v2797_v12 = vcombine.high %v1060_v9, %v1064_v10  ;;  %v1072_v15 = vld [vmem:[#allocation7 + $0x160] sm:$0xff]  ;;  %v2796_v16 = vcombine.low %v1060_v9, %v1064_v10  ;;  %v1054_v9 = vld [vmem:[#allocation7 + $0xd0] sm:$0xff] }
  0x8c   :  { %3120 = vmatpush3.bf16.msra.mxu0 %v3260_v34  ;;  %v1053_v34 = vld [vmem:[#allocation7 + $0xc8] sm:$0xff]  ;;  %v2804_v19 = vcombine.low %v1068_v13, %v1072_v15  ;;  %v1058_v10 = vld [vmem:[#allocation7 + $0xf0] sm:$0xff] }
  0x8d   :  { %3121 = vmatprep.subr.bf16.mxu0 %v3432_v29 }
  0x90   :  { %3122 = vmatpush3.bf16.msra.mxu0 %v3261_v35  ;;  %v1057_v35 = vld [vmem:[#allocation7 + $0xe8] sm:$0xff] }
  0x91   :  { %3123 = vmatprep.subr.bf16.mxu0 %v3432_v29 }
  0x94   :  { %3124 = vmatpush3.bf16.msra.mxu0 %v3262_v37  ;;  %v2791_v37 = vcombine.high %v1053_v34, %v1057_v35 }
  0x95   :  { %3125 = vmatprep.subr.bf16.mxu0 %v3432_v29 }
  0x98   :  { %3126 = vmatpush3.bf16.msra.mxu0 %v3263_v38  ;;  %v2790_v38 = vcombine.low %v1053_v34, %v1057_v35 }
  0x99   :  { %1495 = vmatprep.subr.bf16.mxu0 %v2767_v18  ;;  %v1080_v18 = vld [vmem:[#allocation7 + $0x1a0] sm:$0xff] }
 0x12e   :  { %v2923_v42 = vpop.f32.mrb[0].mxu0 }
 0x12f   :  { %v2924_v44 = vpop.f32.mrb[1].mxu0  ;;  %v2945_v45 = vpop.f32.mrb[0].mxu1 }
 0x130   :  { %v2925_v47 = vadd.f32 %v2924_v44, %v2923_v42  ;;  %v2926_v49 = vpop.f32.mrb[2].mxu0  ;;  %v2946_v50 = vpop.f32.mrb[1].mxu1  ;;  %v2798_v42 = vcombine.low %v1061_v39, %v1065_v40  ;;  %v1073_v44 = vld [vmem:[#allocation7 + $0x168] sm:$0xff]  ;;  %v1034_v39 = vld [vmem:[#allocation7 + $0x30] sm:$0xff]  ;;  %v1031_v40 = vld [vmem:[#allocation7 + $0x18] sm:$0xff] }
 0x131   :  { %v2927_v52 = vpop.f32.mrb[3].mxu0  ;;  %v2947_v55 = vadd.f32 %v2946_v50, %v2945_v45  ;;  %v2948_v56 = vpop.f32.mrb[2].mxu1  ;;  %v1077_v49 = vld [vmem:[#allocation7 + $0x188] sm:$0xff] }
 0x132   :  { %v704_v54 = vadd.f32 %v2925_v47, %v2684_v43  ;;  %v2949_v57 = vpop.f32.mrb[3].mxu1  ;;  %v1069_v43 = vld [vmem:[#allocation7 + $0x148] sm:$0xff] }
 0x133   :  { %v2807_v45 = vcombine.high %v1069_v43, %v1073_v44  ;;  %v2806_v47 = vcombine.low %v1069_v43, %v1073_v44  ;;  %v1081_v50 = vld [vmem:[#allocation7 + $0x1a8] sm:$0xff]  ;;  %v1036_v57 = vld [vmem:[#allocation7 + $0x40] sm:$0xff]  ;;  %v1035_v44 = vld [vmem:[#allocation7 + $0x38] sm:$0xff] }
 0x134   :  { %v744_v58 = vadd.f32 %v2947_v55, %v704_v54  ;;  %v2815_v52 = vcombine.high %v1077_v49, %v1081_v50  ;;  %v2814_v54 = vcombine.low %v1077_v49, %v1081_v50  ;;  %v2749_v55 = vld [vmem:[%s3787_s5] ss:$0 sm:$0xff] }
 0x135   :  { %v2758_v49 = vld [vmem:[%s3789_s7] ss:$0 sm:$0xff] }
 0x14e   :  { %v2967_v59 = vpop.f32.mrb[4].mxu0 }
 0x14f   :  { %v2968_v60 = vpop.f32.mrb[5].mxu0  ;;  %v2989_v61 = vpop.f32.mrb[4].mxu1 }
 0x150   :  { %v2969_v62 = vadd.f32 %v2968_v60, %v2967_v59  ;;  %v2970_v63 = vpop.f32.mrb[6].mxu0  ;;  %v2990_v0 = vpop.f32.mrb[5].mxu1 }
 0x151   :  { %v2971_v1 = vpop.f32.mrb[7].mxu0  ;;  %v2991_v3 = vadd.f32 %v2990_v0, %v2989_v61  ;;  %v2992_v4 = vpop.f32.mrb[6].mxu1 }
 0x152   :  { %v784_v2 = vadd.f32 %v2969_v62, %v744_v58  ;;  %v2993_v5 = vpop.f32.mrb[7].mxu1  ;;  %v1040_v58 = vld [vmem:[#allocation7 + $0x60] sm:$0xff] }
 0x153   :  { %v2773_v0 = vcombine.high %v1036_v57, %v1040_v58  ;;  %v1044_v1 = vld [vmem:[#allocation7 + $0x80] sm:$0xff] }
 0x154   :  { %v824_v6 = vadd.f32 %v2991_v3, %v784_v2  ;;  %v1048_v2 = vld [vmem:[#allocation7 + $0xa0] sm:$0xff]  ;;  %v2772_v3 = vcombine.low %v1036_v57, %v1040_v58  ;;  %v1042_v57 = vld [vmem:[#allocation7 + $0x70] sm:$0xff]  ;;  %v1039_v58 = vld [vmem:[#allocation7 + $0x58] sm:$0xff] }
 0x155   :  { %v2781_v4 = vcombine.high %v1044_v1, %v1048_v2  ;;  %v1052_v5 = vld [vmem:[#allocation7 + $0xc0] sm:$0xff] }
 0x156   :  { %v829_v7 = vmax.f32 %v824_v6, 0.0  ;;  %v1056_v6 = vld [vmem:[#allocation7 + $0xe0] sm:$0xff] }
 0x157   :  { %v2788_v11 = vcombine.low %v1052_v5, %v1056_v6 }
 0x158   :  { %v830_v8 = vpack.c.bf16 %v829_v7, %v829_v7  ;;  %v2780_v7 = vcombine.low %v1044_v1, %v1048_v2  ;;  %v1046_v1 = vld [vmem:[#allocation7 + $0x90] sm:$0xff] }
 0x159   :  { %v1050_v2 = vld [vmem:[#allocation7 + $0xb0] sm:$0xff] }
 0x15a   :  { %3128 = vmatmul.mubr.bf16.vlgmr.msra.gmra.mrb[8].mxu0 %v830_v8  ;;  %v2789_v8 = vcombine.high %v1052_v5, %v1056_v6 }
 0x15b   :  { %1496 = vmatpush1.bf16.msra.mxu0 %v2766_v17  ;;  %v1076_v17 = vld [vmem:[#allocation7 + $0x180] sm:$0xff] }
 0x15c   :  { %1497 = vmatprep.subr.bf16.mxu0 %v2775_v21  ;;  %v2813_v20 = vcombine.high %v1076_v17, %v1080_v18  ;;  %v2812_v21 = vcombine.low %v1076_v17, %v1080_v18  ;;  %v1062_v17 = vld [vmem:[#allocation7 + $0x110] sm:$0xff] }
 0x15d   :  { %v1066_v18 = vld [vmem:[#allocation7 + $0x130] sm:$0xff] }
 0x15f   :  { %1498 = vmatpush1.bf16.msra.mxu0 %v2774_v24  ;;  %v1084_v24 = vld [vmem:[#allocation7 + $0x1c0] sm:$0xff] }
 0x160   :  { %1499 = vmatprep.subr.bf16.mxu0 %v2783_v32  ;;  %v2821_v32 = vcombine.high %v1084_v24, %v1088_v28  ;;  %v2820_v34 = vcombine.low %v1084_v24, %v1088_v28  ;;  %v2801_v28 = vcombine.high %v1062_v17, %v1066_v18 }
 0x163   :  { %1500 = vmatpush1.bf16.msra.mxu0 %v2782_v33  ;;  %v1089_v33 = vld [vmem:[#allocation7 + $0x1e8] sm:$0xff] }
 0x164   :  { %1501 = vmatprep.subr.bf16.mxu0 %v2791_v37  ;;  %v2822_v35 = vcombine.low %v1085_v30, %v1089_v33  ;;  %v2823_v37 = vcombine.high %v1085_v30, %v1089_v33  ;;  %v1074_v33 = vld [vmem:[#allocation7 + $0x170] sm:$0xff] }
 0x167   :  { %1502 = vmatpush1.bf16.msra.mxu0 %v2790_v38  ;;  %v1030_v38 = vld [vmem:[#allocation7 + $0x10] sm:$0xff] }
 0x168   :  { %1503 = vmatprep.subr.bf16.mxu0 %v2799_v41  ;;  %v3434_v41 = vmov 0   ;;  %v2769_v43 = vcombine.high %v1030_v38, %v1034_v39 }
 0x169   :  { %1527 = vmatprep.mubr.bf16.mxu0 %v3434_v41  ;;  %3188 = vset.pattern.permute.xlu1 %v3434_v41 }
 0x16a   :  { %3189 = vset.pattern.permute.xlu0 %v3434_v41 }
 0x16b   :  { %1504 = vmatpush1.bf16.msra.mxu0 %v2798_v42  ;;  %v2768_v42 = vcombine.low %v1030_v38, %v1034_v39 }
 0x16c   :  { %1505 = vmatprep.subr.bf16.mxu0 %v2807_v45  ;;  %v2770_v45 = vcombine.low %v1031_v40, %v1035_v44 }
 0x16f   :  { %1506 = vmatpush1.bf16.msra.mxu0 %v2806_v47  ;;  %v2771_v47 = vcombine.high %v1031_v40, %v1035_v44  ;;  %v1083_v44 = vld [vmem:[#allocation7 + $0x1b8] sm:$0xff] }
 0x170   :  { %1507 = vmatprep.subr.bf16.mxu0 %v2815_v52 }
 0x173   :  { %1508 = vmatpush1.bf16.msra.mxu0 %v2814_v54 }
 0x174   :  { %1509 = vmatprep.subr.bf16.mxu0 %v2823_v37  ;;  %v2800_v37 = vcombine.low %v1062_v17, %v1066_v18  ;;  %v3285_v17 = vld [vmem:[#allocation9 + $0xc8] sm:$0xff]  }
 0x175   :  { %v3286_v18 = vld [vmem:[#allocation9 + $0x28] sm:$0xff]  }
 0x177   :  { %1510 = vmatpush1.bf16.msra.mxu0 %v2822_v35  ;;  %v1075_v35 = vld [vmem:[#allocation7 + $0x178] sm:$0xff] }
 0x178   :  { %1577 = vmatprep.subr.bf16.mxu0 %v2771_v47 }
 0x22d   :  { %v936_v56 = vpop.f32.mrb[8].mxu0 }
 0x22e   :  { %v937_v59 = vadd.f32 %v2749_v55, %v936_v56  ;;  %v3129_v60 = vpop.f32.mrb[9].mxu0  ;;  %v1038_v55 = vld [vmem:[#allocation7 + $0x50] sm:$0xff] }
 0x22f   :  { %v939_v61 = vpop.f32.mrb[10].mxu0  ;;  %v2776_v5 = vcombine.low %v1038_v55, %v1042_v57 }
 0x230   :  { %v942_v62 = vpack.c.bf16 %v937_v59, %v937_v59  ;;  %1733 = vst.msk [vmem:[#allocation2] sm:$0x3] %vm1732_vm1, %v937_v59  ;;  %v3130_v63 = vpop.f32.mrb[11].mxu0  ;;  %v1043_v59 = vld [vmem:[#allocation7 + $0x78] sm:$0xff] }
 0x231   :  { %v2777_v63 = vcombine.high %v1038_v55, %v1042_v57  ;;  %v2778_v6 = vcombine.low %v1039_v58, %v1043_v59  ;;  %v1087_v55 = vld [vmem:[#allocation7 + $0x1d8] sm:$0xff] }
 0x232   :  { %3140 = vmatmul.mubr.msk.bf16.vlgmr.msra.gmra.mrb[8].mxu1 %vm982_vm2, %v942_v62 }
 0x233   :  { %1455 = vmatpush1.bf16.msra.mxu1 %v2764_v14  ;;  %v2805_v14 = vcombine.high %v1068_v13, %v1072_v15  ;;  %1486 = vmatprep.mubr.bf16.mxu1 %v3434_v41  ;;  %v2784_v13 = vcombine.low %v1046_v1, %v1050_v2 }
 0x234   :  { %1456 = vmatprep.subr.bf16.mxu1 %v2773_v0  ;;  %v2779_v0 = vcombine.high %v1039_v58, %v1043_v59 }
 0x237   :  { %1457 = vmatpush1.bf16.msra.mxu1 %v2772_v3  ;;  %v1047_v3 = vld [vmem:[#allocation7 + $0x98] sm:$0xff] }
 0x238   :  { %1458 = vmatprep.subr.bf16.mxu1 %v2781_v4  ;;  %v1051_v4 = vld [vmem:[#allocation7 + $0xb8] sm:$0xff] }
 0x239   :  { %v2786_v15 = vcombine.low %v1047_v3, %v1051_v4 }
 0x23b   :  { %1459 = vmatpush1.bf16.msra.mxu1 %v2780_v7  ;;  %v2785_v7 = vcombine.high %v1046_v1, %v1050_v2  ;;  %v3269_v1 = vld [vmem:[%s3793_s11] sm:$0xff]   ;;  %v3270_v2 = vld [vmem:[#allocation9] sm:$0xff]  }
 0x23c   :  { %1460 = vmatprep.subr.bf16.mxu1 %v2789_v8  ;;  %v2787_v8 = vcombine.high %v1047_v3, %v1051_v4  ;;  %v3271_v3 = vld [vmem:[#allocation9 + $0x48] sm:$0xff]   ;;  %v3272_v4 = vld [vmem:[%s3793_s11 + $0x8] sm:$0xff]  }
 0x23f   :  { %1461 = vmatpush1.bf16.msra.mxu1 %v2788_v11  ;;  %v1055_v11 = vld [vmem:[#allocation7 + $0xd8] sm:$0xff] }
 0x240   :  { %1462 = vmatprep.subr.bf16.mxu1 %v2797_v12  ;;  %v1059_v12 = vld [vmem:[#allocation7 + $0xf8] sm:$0xff] }
 0x241   :  { %v2794_v24 = vcombine.low %v1055_v11, %v1059_v12 }
 0x243   :  { %1463 = vmatpush1.bf16.msra.mxu1 %v2796_v16  ;;  %v2793_v16 = vcombine.high %v1054_v9, %v1058_v10 }
 0x244   :  { %1464 = vmatprep.subr.bf16.mxu1 %v2805_v14  ;;  %v2795_v14 = vcombine.high %v1055_v11, %v1059_v12  ;;  %v3281_v11 = vld [vmem:[#allocation9 + $0xc0] sm:$0xff]   ;;  %v1736_v12 = vld [vmem:[#allocation2] sm:$0xf] }
 0x247   :  { %1465 = vmatpush1.bf16.msra.mxu1 %v2804_v19  ;;  %v1063_v19 = vld [vmem:[#allocation7 + $0x118] sm:$0xff] }
 0x248   :  { %1466 = vmatprep.subr.bf16.mxu1 %v2813_v20  ;;  %v1067_v20 = vld [vmem:[#allocation7 + $0x138] sm:$0xff] }
 0x249   :  { %v2803_v30 = vcombine.high %v1063_v19, %v1067_v20  ;;  %v2802_v38 = vcombine.low %v1063_v19, %v1067_v20  ;;  %v3287_v19 = vld [vmem:[#allocation9 + $0x88] sm:$0xff]   ;;  %v3288_v20 = vld [vmem:[#allocation9 + $0x70] sm:$0xff]  }
 0x24b   :  { %1467 = vmatpush1.bf16.msra.mxu1 %v2812_v21  ;;  %v2792_v21 = vcombine.low %v1054_v9, %v1058_v10  ;;  %v3278_v9 = vld [vmem:[%s3793_s11 + $0x18] sm:$0xff]   ;;  %v3279_v10 = vld [vmem:[#allocation9 + $0x18] sm:$0xff]  }
 0x24c   :  { %1468 = vmatprep.subr.bf16.mxu1 %v2821_v32  ;;  %v1070_v32 = vld [vmem:[#allocation7 + $0x150] sm:$0xff] }
 0x24d   :  { %v2809_v39 = vcombine.high %v1070_v32, %v1074_v33 }
 0x24f   :  { %1469 = vmatpush1.bf16.msra.mxu1 %v2820_v34  ;;  %v1071_v34 = vld [vmem:[#allocation7 + $0x158] sm:$0xff] }
 0x250   :  { %1536 = vmatprep.subr.bf16.mxu1 %v2769_v43  ;;  %v2811_v40 = vcombine.high %v1071_v34, %v1075_v35  ;;  %v1079_v43 = vld [vmem:[#allocation7 + $0x198] sm:$0xff]  ;;  %v2810_v47 = vcombine.low %v1071_v34, %v1075_v35  ;;  %v3296_v35 = vld [vmem:[#allocation9 + $0xe0] sm:$0xff]  }
 0x251   :  { %v2818_v58 = vcombine.low %v1079_v43, %v1083_v44  ;;  %v3295_v34 = vld [vmem:[#allocation9 + $0x98] sm:$0xff]  }
 0x305   :  { %v1020_v50 = vpop.f32.mrb[8].mxu1 }
 0x306   :  { %v1021_v52 = vadd.f32 %v2758_v49, %v1020_v50  ;;  %v3141_v54 = vpop.f32.mrb[9].mxu1  ;;  %v2819_v50 = vcombine.high %v1079_v43, %v1083_v44  ;;  %v3304_v43 = vld [vmem:[#allocation9 + $0xf0] sm:$0xff]  }
 0x307   :  { %v1023_v56 = vpop.f32.mrb[10].mxu1  ;;  %v1090_v54 = vld [vmem:[#allocation7 + $0x1f0] sm:$0xff] }
 0x308   :  { %v1026_v60 = vmax.f32 %v1021_v52, 0.0  ;;  %v3142_v61 = vpop.f32.mrb[11].mxu1  ;;  %v1086_v52 = vld [vmem:[#allocation7 + $0x1d0] sm:$0xff]  ;;  %v1091_v56 = vld [vmem:[#allocation7 + $0x1f8] sm:$0xff] }
 0x309   :  { %v2825_v59 = vcombine.high %v1086_v52, %v1090_v54  ;;  %v2824_v61 = vcombine.low %v1086_v52, %v1090_v54  ;;  %v3305_v44 = vld [vmem:[#allocation9 + $0x150] sm:$0xff]   ;;  %v3311_v52 = vld [vmem:[#allocation9 + $0x118] sm:$0xff]   ;;  %v3312_v54 = vld [vmem:[#allocation9 + $0x160] sm:$0xff]  }
 0x30a   :  { %v3666_v62 = vpack.c.bf16 %v1026_v60, %v1026_v60  ;;  %v2827_v60 = vcombine.high %v1087_v55, %v1091_v56 }
 0x30c   :  { %1487 = vmatmul.mubr.bf16.vlgmr.msra.gmra.mrb[12].mxu1 %v3666_v62  ;;  %1528 = vmatmul.mubr.bf16.vlgmr.msra.gmra.mrb[12].mxu0 %v3666_v62 }
 0x30d   :  { %1537 = vmatpush1.bf16.msra.mxu1 %v2768_v42  ;;  %1578 = vmatpush1.bf16.msra.mxu0 %v2770_v45  ;;  %v1082_v42 = vld [vmem:[#allocation7 + $0x1b0] sm:$0xff]  ;;  %v2808_v45 = vcombine.low %v1070_v32, %v1074_v33  ;;  %v3293_v32 = vld [vmem:[#allocation9 + $0xd8] sm:$0xff]  }
 0x30e   :  { %1538 = vmatprep.subr.bf16.mxu1 %v2777_v63  ;;  %1579 = vmatprep.subr.bf16.mxu0 %v2779_v0  ;;  %v2826_v63 = vcombine.low %v1087_v55, %v1091_v56  ;;  %v3268_v0 = vld [vmem:[#allocation9 + $0x40] sm:$0xff]   ;;  %v3294_v33 = vld [vmem:[#allocation9 + $0x38] sm:$0xff]  }
 0x30f   :  { %1568 = vmatprep.mubr.bf16.mxu1 %v3434_v41  ;;  %1609 = vmatprep.mubr.bf16.mxu0 %v3434_v41  ;;  %v1078_v41 = vld [vmem:[#allocation7 + $0x190] sm:$0xff]  ;;  %v3313_v55 = vld [vmem:[#allocation9 + $0x1c0] sm:$0xff]  }
 0x310   :  { %v2817_v49 = vcombine.high %v1078_v41, %v1082_v42  ;;  %v2816_v57 = vcombine.low %v1078_v41, %v1082_v42  ;;  %v3302_v41 = vld [vmem:[#allocation9 + $0xa8] sm:$0xff]   ;;  %v3314_v56 = vld [vmem:[#allocation9 + $0x120] sm:$0xff]  }
 0x311   :  { %1539 = vmatpush1.bf16.msra.mxu1 %v2776_v5  ;;  %1580 = vmatpush1.bf16.msra.mxu0 %v2778_v6  ;;  %v3273_v5 = vld [vmem:[#allocation9 + $0x8] sm:$0xff]   ;;  %v3274_v6 = vld [vmem:[#allocation9 + $0x50] sm:$0xff]  }
 0x312   :  { %1540 = vmatprep.subr.bf16.mxu1 %v2785_v7  ;;  %1581 = vmatprep.subr.bf16.mxu0 %v2787_v8  ;;  %v3276_v7 = vld [vmem:[#allocation9 + $0x10] sm:$0xff]   ;;  %v3277_v8 = vld [vmem:[#allocation9 + $0x58] sm:$0xff]   ;;  %v3303_v42 = vld [vmem:[#allocation9 + $0x108] sm:$0xff]  }
 0x315   :  { %1541 = vmatpush1.bf16.msra.mxu1 %v2784_v13  ;;  %1582 = vmatpush1.bf16.msra.mxu0 %v2786_v15  ;;  %v3282_v13 = vld [vmem:[#allocation9 + $0x20] sm:$0xff]  }
 0x316   :  { %1542 = vmatprep.subr.bf16.mxu1 %v2793_v16  ;;  %1583 = vmatprep.subr.bf16.mxu0 %v2795_v14  ;;  %v3283_v15 = vld [vmem:[#allocation9 + $0x80] sm:$0xff]   ;;  %v1737_v16 = vpack.c.bf16 %v1736_v12, %v1736_v12  ;;  %v3284_v14 = vld [vmem:[#allocation9 + $0x68] sm:$0xff]   ;;  %v3340_v12 = vld [vmem:[%s3795_s13 + $0x20] sm:$0xff]  }
 0x319   :  { %1543 = vmatpush1.bf16.msra.mxu1 %v2792_v21  ;;  %1584 = vmatpush1.bf16.msra.mxu0 %v2794_v24  ;;  %v3289_v21 = vld [vmem:[#allocation9 + $0xd0] sm:$0xff]  }
 0x31a   :  { %1544 = vmatprep.subr.bf16.mxu1 %v2801_v28  ;;  %1585 = vmatprep.subr.bf16.mxu0 %v2803_v30  ;;  %v3290_v24 = vld [vmem:[#allocation9 + $0x30] sm:$0xff]   ;;  %v3292_v30 = vld [vmem:[#allocation9 + $0x78] sm:$0xff]  }
 0x31b   :  { %v3291_v28 = vld [vmem:[#allocation9 + $0x90] sm:$0xff]  }
 0x31d   :  { %1545 = vmatpush1.bf16.msra.mxu1 %v2800_v37  ;;  %1586 = vmatpush1.bf16.msra.mxu0 %v2802_v38  ;;  %v3297_v37 = vld [vmem:[#allocation9 + $0x140] sm:$0xff]  }
 0x31e   :  { %1546 = vmatprep.subr.bf16.mxu1 %v2809_v39  ;;  %1587 = vmatprep.subr.bf16.mxu0 %v2811_v40  ;;  %v3298_v38 = vld [vmem:[#allocation9 + $0xa0] sm:$0xff]   ;;  %v3300_v39 = vld [vmem:[#allocation9 + $0xe8] sm:$0xff]  }
 0x31f   :  { %v3301_v40 = vld [vmem:[#allocation9 + $0x148] sm:$0xff]  }
 0x321   :  { %1547 = vmatpush1.bf16.msra.mxu1 %v2808_v45  ;;  %1588 = vmatpush1.bf16.msra.mxu0 %v2810_v47  ;;  %v3306_v45 = vld [vmem:[#allocation9 + $0xb0] sm:$0xff]  }
 0x322   :  { %1548 = vmatprep.subr.bf16.mxu1 %v2817_v49  ;;  %1589 = vmatprep.subr.bf16.mxu0 %v2819_v50  ;;  %v3307_v47 = vld [vmem:[#allocation9 + $0x110] sm:$0xff]   ;;  %v3308_v49 = vld [vmem:[#allocation9 + $0xf8] sm:$0xff]  }
 0x323   :  { %v3309_v50 = vld [vmem:[#allocation9 + $0x158] sm:$0xff]  }
 0x325   :  { %1549 = vmatpush1.bf16.msra.mxu1 %v2816_v57  ;;  %1590 = vmatpush1.bf16.msra.mxu0 %v2818_v58  ;;  %v3316_v57 = vld [vmem:[#allocation9 + $0x168] sm:$0xff]  }
 0x326   :  { %1550 = vmatprep.subr.bf16.mxu1 %v2825_v59  ;;  %1591 = vmatprep.subr.bf16.mxu0 %v2827_v60  ;;  %v3317_v58 = vld [vmem:[#allocation9 + $0x1c8] sm:$0xff]  }
 0x327   :  { %v3318_v59 = vld [vmem:[#allocation9 + $0x128] sm:$0xff]  }
 0x328   :  { %v3319_v60 = vld [vmem:[#allocation9 + $0x188] sm:$0xff]  }
 0x329   :  { %1551 = vmatpush1.bf16.msra.mxu1 %v2824_v61  ;;  %1592 = vmatpush1.bf16.msra.mxu0 %v2826_v63  ;;  %v3320_v61 = vld [vmem:[#allocation9 + $0x170] sm:$0xff]  }
 0x32a   :  { %3143 = vmatprep.subr.bf16.mxu1 %v3432_v29  ;;  %3014 = vmatprep.subr.bf16.mxu0 %v3268_v0  ;;  %v3321_v63 = vld [vmem:[#allocation9 + $0x1d0] sm:$0xff]  }
 0x32b   :  { %v3322_v0 = vld [vmem:[#allocation9 + $0x130] sm:$0xff]  }
 0x32c   :  { %1569 = vmatmul.mubr.bf16.vlgmr.msra.gmra.mrb[16].mxu1 %v3666_v62  ;;  %1610 = vmatmul.mubr.bf16.vlgmr.msra.gmra.mrb[16].mxu0 %v3666_v62  ;;  %v3275_v62 = vld [vmem:[%s3793_s11 + $0x10] sm:$0xff]  }
 0x32d   :  { %3144 = vmatpush3.bf16.msra.mxu1 %v3269_v1  ;;  %3015 = vmatpush3.bf16.msra.mxu0 %v3270_v2  ;;  %v3323_v1 = vld [vmem:[#allocation9 + $0x190] sm:$0xff]   ;;  %v3324_v2 = vld [vmem:[#allocation9 + $0x178] sm:$0xff]  }
 0x32e   :  { %3145 = vmatprep.subr.bf16.mxu1 %v3432_v29  ;;  %3016 = vmatprep.subr.bf16.mxu0 %v3271_v3  ;;  %v3325_v3 = vld [vmem:[#allocation9 + $0x1d8] sm:$0xff]  }
 0x32f   :  { %3151 = vmatprep.mubr.msk.bf16.mxu1 %vm3433_vm0, %v3432_v29  ;;  %2364 = vmatprep.mubr.bf16.mxu0 %v3572_v48  ;;  %v3280_v48 = vld [vmem:[#allocation9 + $0x60] sm:$0xff]  }
 0x331   :  { %3146 = vmatpush3.bf16.msra.mxu1 %v3272_v4  ;;  %3017 = vmatpush3.bf16.msra.mxu0 %v3273_v5  ;;  %v3327_v4 = vld [vmem:[#allocation9 + $0x198] sm:$0xff]   ;;  %v3328_v5 = vld [vmem:[#allocation9 + $0x1e0] sm:$0xff]  }
 0x332   :  { %3147 = vmatprep.subr.bf16.mxu1 %v3432_v29  ;;  %3018 = vmatprep.subr.bf16.mxu0 %v3274_v6  ;;  %v3329_v6 = vld [vmem:[#allocation9 + $0x1a0] sm:$0xff]  }
 0x335   :  { %3148 = vmatpush3.bf16.msra.mxu1 %v3275_v62  ;;  %3019 = vmatpush3.bf16.msra.mxu0 %v3276_v7  ;;  %v3331_v62 = vld [vmem:[#allocation9 + $0x1a8] sm:$0xff]   ;;  %v3332_v7 = vld [vmem:[#allocation9 + $0x1f0] sm:$0xff]  }
 0x336   :  { %3149 = vmatprep.subr.bf16.mxu1 %v3432_v29  ;;  %3020 = vmatprep.subr.bf16.mxu0 %v3277_v8  ;;  %v3333_v8 = vld [vmem:[#allocation9 + $0x1b0] sm:$0xff]  }
 0x339   :  { %3150 = vmatpush3.bf16.msra.mxu1 %v3278_v9  ;;  %3021 = vmatpush3.bf16.msra.mxu0 %v3279_v10  ;;  %v3334_v9 = vld [vmem:[#allocation9 + $0x1f8] sm:$0xff]  }
 0x33a   :  { %3022 = vmatprep.subr.bf16.mxu0 %v3280_v48  ;;  %3036 = vmatprep.subr.bf16.mxu1 %v3281_v11  ;;  %v3335_v10 = vld [vmem:[#allocation9 + $0x1b8] sm:$0xff]   ;;  %v3338_v11 = vld [vmem:[%s3795_s13 + $0x10] sm:$0xff]  }
 0x33b   :  { %v3337_v48 = vld [vmem:[%s3795_s13 + $0x8] sm:$0xff]  }
 0x33c   :  { %3152 = vmatmul.mubr.msk.bf16.vlgmr.msra.gmra.mrb[20].mxu1 %vm982_vm2, %v1737_v16  ;;  %v1104_v16 = vsub.s32 2, %v3560_v31 }
 0x33d   :  { %3023 = vmatpush3.bf16.msra.mxu0 %v3282_v13  ;;  %3037 = vmatpush3.bf16.msra.mxu1 %v3283_v15  ;;  %v3341_v13 = vld [vmem:[%s3795_s13 + $0x28] sm:$0xff]   ;;  %v1096_v15 = vsub.s32 0, %v3560_v31 }
 0x33e   :  { %3024 = vmatprep.subr.bf16.mxu0 %v3284_v14  ;;  %3038 = vmatprep.subr.bf16.mxu1 %v3285_v17  ;;  %v1092_v14 = vld [vmem:[%s3791_s9] sm:$0xff]  ;;  %v1100_v17 = vsub.s32 1, %v3560_v31 }
 0x33f   :  { %2404 = vmatprep.mubr.bf16.mxu1 %v3577_v53  ;;  %v3299_v53 = vld [vmem:[#allocation9 + $0x100] sm:$0xff]  }
 0x341   :  { %3025 = vmatpush3.bf16.msra.mxu0 %v3286_v18  ;;  %3039 = vmatpush3.bf16.msra.mxu1 %v3287_v19  ;;  %v1108_v18 = vsub.s32 3, %v3560_v31  ;;  %v3342_v19 = vld [vmem:[%s3795_s13 + $0x30] sm:$0xff]  }
 0x342   :  { %3026 = vmatprep.subr.bf16.mxu0 %v3288_v20  ;;  %3040 = vmatprep.subr.bf16.mxu1 %v3289_v21  ;;  %v1097_v20 = vrot.slane %v1092_v14, %v1096_v15  ;;  %v1105_v21 = vrot.slane %v1092_v14, %v1104_v16  ;;  %v3353_v16 = vld [vmem:[%s3801_s0 + $0x8] sm:$0xff] }
 0x345   :  { %3027 = vmatpush3.bf16.msra.mxu0 %v3290_v24  ;;  %3041 = vmatpush3.bf16.msra.mxu1 %v3291_v28  ;;  %v1101_v24 = vrot.slane %v1092_v14, %v1100_v17  ;;  %v1109_v28 = vrot.slane %v1092_v14, %v1108_v18 }
 0x346   :  { %3028 = vmatprep.subr.bf16.mxu0 %v3292_v30  ;;  %3042 = vmatprep.subr.bf16.mxu1 %v3293_v32  ;;  %v3343_v30 = vld [vmem:[%s3795_s13 + $0x38] sm:$0xff]  }
 0x349   :  { %3029 = vmatpush3.bf16.msra.mxu0 %v3294_v33  ;;  %3043 = vmatpush3.bf16.msra.mxu1 %v3295_v34 }
 0x34a   :  { %3044 = vmatprep.subr.bf16.mxu1 %v3296_v35  ;;  %3058 = vmatprep.subr.bf16.mxu0 %v3297_v37 }
 0x34c   :  { %2365 = vmatmul.mubr.bf16.vlgmr.msra.gmra.mrb[20].mxu0 %v3570_v46  ;;  %v3310_v46 = vld [vmem:[#allocation9 + $0xb8] sm:$0xff]  }
 0x34d   :  { %3045 = vmatpush3.bf16.msra.mxu1 %v3298_v38  ;;  %3059 = vmatpush3.bf16.msra.mxu0 %v3299_v53 }
 0x34e   :  { %3046 = vmatprep.subr.bf16.mxu1 %v3300_v39  ;;  %3060 = vmatprep.subr.bf16.mxu0 %v3301_v40 }
 0x34f   :  { %2444 = vmatprep.mubr.bf16.mxu0 %v3589_v23  ;;  %v3315_v23 = vld [vmem:[#allocation9 + $0x180] sm:$0xff]  }
 0x351   :  { %3047 = vmatpush3.bf16.msra.mxu1 %v3302_v41  ;;  %3061 = vmatpush3.bf16.msra.mxu0 %v3303_v42 }
 0x352   :  { %3048 = vmatprep.subr.bf16.mxu1 %v3304_v43  ;;  %3062 = vmatprep.subr.bf16.mxu0 %v3305_v44 }
 0x355   :  { %3049 = vmatpush3.bf16.msra.mxu1 %v3306_v45  ;;  %3063 = vmatpush3.bf16.msra.mxu0 %v3307_v47 }
 0x356   :  { %3050 = vmatprep.subr.bf16.mxu1 %v3308_v49  ;;  %3064 = vmatprep.subr.bf16.mxu0 %v3309_v50  ;;  %v3352_v50 = vld [vmem:[%s3801_s0] sm:$0xff] }
 0x359   :  { %3051 = vmatpush3.bf16.msra.mxu1 %v3310_v46  ;;  %3065 = vmatpush3.bf16.msra.mxu0 %v3311_v52 }
 0x35a   :  { %3066 = vmatprep.subr.bf16.mxu0 %v3312_v54  ;;  %3080 = vmatprep.subr.bf16.mxu1 %v3313_v55  ;;  %v1112_v54 = vsub.s32 4, %v3560_v31  ;;  %v1120_v55 = vsub.s32 6, %v3560_v31 }
 0x35c   :  { %2405 = vmatmul.mubr.bf16.vlgmr.msra.gmra.mrb[24].mxu1 %v3574_v51  ;;  %v3326_v51 = vld [vmem:[#allocation9 + $0x138] sm:$0xff]  }
 0x35d   :  { %3067 = vmatpush3.bf16.msra.mxu0 %v3314_v56  ;;  %3081 = vmatpush3.bf16.msra.mxu1 %v3315_v23  ;;  %v1116_v56 = vsub.s32 5, %v3560_v31  ;;  %v1124_v23 = vsub.s32 7, %v3560_v31 }
 0x35e   :  { %3068 = vmatprep.subr.bf16.mxu0 %v3316_v57  ;;  %3082 = vmatprep.subr.bf16.mxu1 %v3317_v58  ;;  %v1113_v58 = vrot.slane %v1092_v14, %v1112_v54 }
 0x35f   :  { %2484 = vmatprep.mubr.bf16.mxu1 %v3594_v27  ;;  %v3330_v27 = vld [vmem:[#allocation9 + $0x1e8] sm:$0xff]  }
 0x361   :  { %3069 = vmatpush3.bf16.msra.mxu0 %v3318_v59  ;;  %3083 = vmatpush3.bf16.msra.mxu1 %v3319_v60  ;;  %v1121_v59 = vrot.slane %v1092_v14, %v1120_v55  ;;  %v1117_v60 = vrot.slane %v1092_v14, %v1116_v56 }
 0x362   :  { %3070 = vmatprep.subr.bf16.mxu0 %v3320_v61  ;;  %3084 = vmatprep.subr.bf16.mxu1 %v3321_v63  ;;  %v1125_v61 = vrot.slane %v1092_v14, %v1124_v23 }
 0x365   :  { %3071 = vmatpush3.bf16.msra.mxu0 %v3322_v0  ;;  %3085 = vmatpush3.bf16.msra.mxu1 %v3323_v1 }
 0x366   :  { %3072 = vmatprep.subr.bf16.mxu0 %v3324_v2  ;;  %3086 = vmatprep.subr.bf16.mxu1 %v3325_v3 }
 0x369   :  { %3073 = vmatpush3.bf16.msra.mxu0 %v3326_v51  ;;  %3087 = vmatpush3.bf16.msra.mxu1 %v3327_v4 }
 0x36a   :  { %3088 = vmatprep.subr.bf16.mxu1 %v3328_v5  ;;  %3155 = vmatprep.subr.bf16.mxu0 %v3432_v29 }
 0x36c   :  { %2445 = vmatmul.mubr.bf16.vlgmr.msra.gmra.mrb[24].mxu0 %v3587_v22  ;;  %v3336_v22 = vld [vmem:[%s3795_s13] sm:$0xff]  }
 0x36d   :  { %3089 = vmatpush3.bf16.msra.mxu1 %v3329_v6  ;;  %3171 = vmatprep.mubr.msk.bf16.mxu0 %vm3433_vm0, %v3432_v29 }
 0x36e   :  { %3090 = vmatprep.subr.bf16.mxu1 %v3330_v27  ;;  %3156 = vmatpush3.bf16.msra.mxu0 %v3336_v22 }
 0x36f   :  { %3157 = vmatprep.subr.bf16.mxu0 %v3432_v29 }
 0x371   :  { %3091 = vmatpush3.bf16.msra.mxu1 %v3331_v62 }
 0x372   :  { %3092 = vmatprep.subr.bf16.mxu1 %v3332_v7  ;;  %3158 = vmatpush3.bf16.msra.mxu0 %v3337_v48 }
 0x373   :  { %3159 = vmatprep.subr.bf16.mxu0 %v3432_v29 }
 0x375   :  { %3093 = vmatpush3.bf16.msra.mxu1 %v3333_v8 }
 0x376   :  { %3094 = vmatprep.subr.bf16.mxu1 %v3334_v9  ;;  %3160 = vmatpush3.bf16.msra.mxu0 %v3338_v11 }
 0x377   :  { %3161 = vmatprep.subr.bf16.mxu0 %v3432_v29 }
 0x379   :  { %3095 = vmatpush3.bf16.msra.mxu1 %v3335_v10 }
 0x37c   :  { %2485 = vmatmul.mubr.bf16.vlgmr.msra.gmra.mrb[28].mxu1 %v3591_v26  ;;  %v3339_v26 = vld [vmem:[%s3795_s13 + $0x18] sm:$0xff]  }
 0x37d   :  { %3162 = vmatpush3.bf16.msra.mxu0 %v3339_v26 }
 0x37e   :  { %3163 = vmatprep.subr.bf16.mxu0 %v3432_v29 }
 0x381   :  { %3164 = vmatpush3.bf16.msra.mxu0 %v3340_v12 }
 0x382   :  { %3165 = vmatprep.subr.bf16.mxu0 %v3432_v29 }
 0x385   :  { %3166 = vmatpush3.bf16.msra.mxu0 %v3341_v13 }
 0x386   :  { %3167 = vmatprep.subr.bf16.mxu0 %v3432_v29 }
 0x389   :  { %3168 = vmatpush3.bf16.msra.mxu0 %v3342_v19 }
 0x38a   :  { %3169 = vmatprep.subr.bf16.mxu0 %v3432_v29 }
 0x38d   :  { %3170 = vmatpush3.bf16.msra.mxu0 %v3343_v30 }
 0x3df   :  { %v1488_v32 = vpop.f32.mrb[12].mxu1  ;;  %v1529_v33 = vpop.f32.mrb[12].mxu0 }
 0x3e0   :  { %v1489_v34 = vadd.f32 %v1488_v32, %v1097_v20  ;;  %v1530_v35 = vadd.f32 %v1529_v33, %v1105_v21  ;;  %v1490_v37 = vpop.f32.mrb[13].mxu1  ;;  %v1531_v38 = vpop.f32.mrb[13].mxu0 }
 0x3e1   :  { %v1491_v53 = vadd.f32 %v1490_v37, %v1101_v24  ;;  %v1532_v39 = vadd.f32 %v1531_v38, %v1109_v28  ;;  %v1492_v40 = vpop.f32.mrb[14].mxu1  ;;  %v1533_v41 = vpop.f32.mrb[14].mxu0 }
 0x3e2   :  { %v1493_v42 = vpop.f32.mrb[15].mxu1  ;;  %v1534_v43 = vpop.f32.mrb[15].mxu0 }
 0x3e3   :  { %v1626_v44 = vcombine.low %v1489_v34, %v1491_v53  ;;  %v1627_v45 = vcombine.low %v1530_v35, %v1532_v39 }
 0x3e5   :  { %v1634_v47 = vrot.slane %v1626_v44, %v3563_v36  ;;  %v1641_v49 = vrot.slane %v1627_v45, %v3563_v36 }
 0x3e7   :  { %v1642_v29 = vcombine.low %v1634_v47, %v1641_v49 }
 0x3e9   :  { %1662 = vst [vmem:[%s3797_s15] sm:$0xff] %v1642_v29  ;;  %v1664_v46 = vsub.f32 %v3352_v50, %v1642_v29 }
 0x3eb   :  { %v1666_v52 = vmul.f32 %v1664_v46, %v1664_v46 }
 0x3ed   :  { %v1677_v57 = vrot.slane %v1666_v52, %v3563_v36  ;;  %v1670_v5 = vcombine.high %v1666_v52, %v1666_v52  ;;  %v2833_v52 = vld [vmem:[%s3794_s12] ss:$0 sm:$0xff] }
 0x3ef   :  { %v1685_v63 = vcombine.high %v1677_v57, %v1677_v57  ;;  %v1684_v48 = vrot.slane %v1670_v5, %v3563_v36  ;;  %v1713_v11 = vsel %vm1712_vm3, %v1677_v57, 0.0 }
 0x3f1   :  { %v1714_v22 = vsel %vm1712_vm3, %v1685_v63, 0.0  ;;  %v1686_v17 = vcombine.high %v1684_v48, %v1684_v48  ;;  %v1716_v18 = vsel %vm1712_vm3, %v1684_v48, 0.0 }
 0x3f2   :  { %v1715_v13 = vadd.f32 %v1714_v22, %v1713_v11 }
 0x3f3   :  { %v1718_v28 = vsel %vm1712_vm3, %v1686_v17, 0.0 }
 0x3f4   :  { %v1717_v19 = vadd.f32 %v1716_v18, %v1715_v13 }
 0x3f6   :  { %v1719_v30 = vadd.f32 %v1718_v28, %v1717_v19 }
 0x3ff   :  { %v1570_v0 = vpop.f32.mrb[16].mxu1  ;;  %v1611_v1 = vpop.f32.mrb[16].mxu0 }
 0x400   :  { %v1571_v2 = vadd.f32 %v1570_v0, %v1113_v58  ;;  %v1612_v3 = vadd.f32 %v1611_v1, %v1121_v59  ;;  %v1572_v51 = vpop.f32.mrb[17].mxu1  ;;  %v1613_v4 = vpop.f32.mrb[17].mxu0 }
 0x401   :  { %v1573_v6 = vadd.f32 %v1572_v51, %v1117_v60  ;;  %v1614_v27 = vadd.f32 %v1613_v4, %v1125_v61  ;;  %v1574_v62 = vpop.f32.mrb[18].mxu1  ;;  %v1615_v7 = vpop.f32.mrb[18].mxu0 }
 0x402   :  { %v1575_v31 = vpop.f32.mrb[19].mxu1  ;;  %v1616_v8 = vpop.f32.mrb[19].mxu0 }
 0x403   :  { %v1643_v9 = vcombine.low %v1571_v2, %v1573_v6  ;;  %v1644_v10 = vcombine.low %v1612_v3, %v1614_v27 }
 0x405   :  { %v1651_v26 = vrot.slane %v1643_v9, %v3563_v36  ;;  %v1658_v12 = vrot.slane %v1644_v10, %v3563_v36  ;;  %v2898_v9 = vld [vmem:[#allocation4] ss:$0 sm:$0xff] }
 0x407   :  { %v1659_v15 = vcombine.low %v1651_v26, %v1658_v12 }
 0x409   :  { %1663 = vst [vmem:[%s3797_s15 + $0x8] sm:$0xff] %v1659_v15  ;;  %v1665_v14 = vsub.f32 %v3353_v16, %v1659_v15 }
 0x40b   :  { %v1667_v20 = vmul.f32 %v1665_v14, %v1665_v14 }
 0x40d   :  { %v1687_v21 = vcombine.high %v1667_v20, %v1667_v20  ;;  %v1694_v24 = vrot.slane %v1667_v20, %v3563_v36 }
 0x40f   :  { %v1807_v32 = vpop.f32.mrb[20].mxu1  ;;  %v1701_v33 = vrot.slane %v1687_v21, %v3563_v36  ;;  %v1702_v34 = vcombine.high %v1694_v24, %v1694_v24  ;;  %v1720_v35 = vsel %vm1712_vm3, %v1694_v24, 0.0 }
 0x410   :  { %v3153_v37 = vpop.f32.mrb[21].mxu1  ;;  %v1721_v38 = vadd.f32 %v1720_v35, %v1719_v30 }
 0x411   :  { %v1810_v53 = vpop.f32.mrb[22].mxu1  ;;  %v1703_v39 = vcombine.high %v1701_v33, %v1701_v33  ;;  %v1722_v40 = vsel %vm1712_vm3, %v1702_v34, 0.0  ;;  %v1724_v43 = vsel %vm1712_vm3, %v1701_v33, 0.0 }
 0x412   :  { %v3154_v41 = vpop.f32.mrb[23].mxu1  ;;  %v1723_v42 = vadd.f32 %v1722_v40, %v1721_v38 }
 0x413   :  { %v1726_v45 = vsel %vm1712_vm3, %v1703_v39, 0.0 }
 0x414   :  { %v1725_v44 = vadd.f32 %v1724_v43, %v1723_v42 }
 0x416   :  { %v3772_v47 = vadd.f32 %v1726_v45, %v1725_v44 }
 0x41f   :  { %v3030_v49 = vpop.f32.mrb[20].mxu0 }
 0x420   :  { %v3031_v36 = vpop.f32.mrb[21].mxu0 }
 0x421   :  { %v3032_v29 = vadd.f32 %v3031_v36, %v3030_v49  ;;  %v3033_v50 = vpop.f32.mrb[22].mxu0 }
 0x422   :  { %v3034_v46 = vpop.f32.mrb[23].mxu0 }
 0x423   :  { %v2367_v54 = vadd.f32 %v3032_v29, %v2833_v52 }
 0x42f   :  { %v3052_v55 = vpop.f32.mrb[24].mxu1 }
 0x430   :  { %v3053_v56 = vpop.f32.mrb[25].mxu1 }
 0x431   :  { %v3054_v23 = vadd.f32 %v3053_v56, %v3052_v55  ;;  %v3055_v57 = vpop.f32.mrb[26].mxu1 }
 0x432   :  { %v3056_v58 = vpop.f32.mrb[27].mxu1 }
 0x433   :  { %v2407_v59 = vadd.f32 %v3054_v23, %v2367_v54 }
 0x43f   :  { %v3074_v60 = vpop.f32.mrb[24].mxu0 }
 0x440   :  { %v3075_v61 = vpop.f32.mrb[25].mxu0 }
 0x441   :  { %v3076_v63 = vadd.f32 %v3075_v61, %v3074_v60  ;;  %v3077_v0 = vpop.f32.mrb[26].mxu0  ;;  %v2659_v61 = vand.u32 127, %v104_v25 }
 0x442   :  { %v3078_v1 = vpop.f32.mrb[27].mxu0 }
 0x443   :  { %v2447_v2 = vadd.f32 %v3076_v63, %v2407_v59  ;;  %vm2660_vm7 = vcmp.eq.s32.totalorder %v2659_v61, 0  ;;  %vm2662_vm8 = vcmp.eq.s32.totalorder %v2659_v61, 1  ;;  %vm2670_vm9 = vcmp.eq.s32.totalorder %v2659_v61, 2 }
 0x44f   :  { %v3096_v3 = vpop.f32.mrb[28].mxu1 }
 0x450   :  { %v3097_v51 = vpop.f32.mrb[29].mxu1 }
 0x451   :  { %v3098_v4 = vadd.f32 %v3097_v51, %v3096_v3  ;;  %v3099_v5 = vpop.f32.mrb[30].mxu1 }
 0x452   :  { %v3100_v6 = vpop.f32.mrb[31].mxu1 }
 0x453   :  { %v2487_v27 = vadd.f32 %v3098_v4, %v2447_v2 }
 0x455   :  { %2492 = vst [vmem:[#allocation3] sm:$0x3] %v2487_v27  ;;  %2493 = vst [vmem:[#allocation3 + $0x2] sm:$0x3] %v2487_v27 }
 0x45c   :  { %v2494_v62 = vld [vmem:[#allocation3] sm:$0xf] }
 0x45d   :  { %v2495_v7 = vadd.f32 %v2494_v62, %v1807_v32 }
 0x45f   :  { %v2496_v31 = vmax.f32 %v2495_v7, 0.0 }
 0x461   :  { %v2497_v8 = vpack.c.bf16 %v2496_v31, %v2496_v31 }
 0x463   :  { %3172 = vmatmul.mubr.bf16.vlgmr.msra.gmra.mrb[28].mxu0 %v2497_v8 }
 0x536   :  { %v2603_v10 = vpop.f32.mrb[28].mxu0 }
 0x537   :  { %v2604_v22 = vadd.f32 %v2898_v9, %v2603_v10  ;;  %v3173_v48 = vpop.f32.mrb[29].mxu0 }
 0x538   :  { %v2606_v11 = vpop.f32.mrb[30].mxu0 }
 0x539   :  { %v2626_v26 = vand.u32 2147483647, %v2604_v22  ;;  %2665 = vperm.xlu1 %3188, %v2604_v22   ;;  %v3174_v12 = vpop.f32.mrb[31].mxu0  ;;  %v2609_v13 = vsub.f32 0.0, %v2604_v22  ;;  %v2625_v40 = vmax.f32 %v2604_v22, 0.0 }
 0x53b   :  { %v2627_v15 = vsub.f32 0.0, %v2626_v26  ;;  %v2611_v16 = vand.u32 2147483647, %v2609_v13  ;;  %v2610_v44 = vmax.f32 %v2609_v13, 0.0 }
 0x53d   :  { %v2628_v14 = vmul.f32 1.442695, %v2627_v15  ;;  %v2612_v17 = vsub.f32 0.0, %v2611_v16 }
 0x53f   :  { %3344 = vpow2.f32 %v2628_v14  ;;  %v2613_v18 = vmul.f32 1.442695, %v2612_v17 }
 0x541   :  { %3346 = vpow2.f32 %v2613_v18 }
 0x549   :  { %v3345_v19 = vpop.eup %3344 }
 0x54a   :  { %v2630_v20 = vadd.f32 1.0, %v3345_v19  ;;  %v2633_v28 = vmul.f32 -0.5, %v3345_v19  ;;  %v2636_v33 = vand.u32 2147483647, %v3345_v19 }
 0x54b   :  { %v3347_v21 = vpop.eup %3346 }
 0x54c   :  { %v2615_v24 = vadd.f32 1.0, %v3347_v21  ;;  %3348 = vlog2.f32 %v2630_v20  ;;  %v2618_v30 = vmul.f32 -0.5, %v3347_v21  ;;  %v2634_v32 = vadd.f32 1.0, %v2633_v28 }
 0x54d   :  { %v2621_v37 = vand.u32 2147483647, %v3347_v21  ;;  %vm2637_vm4 = vcmp.lt.f32.partialorder %v2636_v33, 0.0004427343 }
 0x54e   :  { %3350 = vlog2.f32 %v2615_v24  ;;  %v2619_v34 = vadd.f32 1.0, %v2618_v30  ;;  %v2635_v53 = vmul.f32 %v3345_v19, %v2634_v32 }
 0x54f   :  { %vm2622_vm5 = vcmp.lt.f32.partialorder %v2621_v37, 0.0004427343 }
 0x550   :  { %v2620_v42 = vmul.f32 %v3347_v21, %v2619_v34 }
 0x556   :  { %v3349_v35 = vpop.eup %3348 }
 0x557   :  { %v2632_v38 = vmul.f32 0.6931472, %v3349_v35 }
 0x558   :  { %v3351_v39 = vpop.eup %3350 }
 0x559   :  { %v2617_v41 = vmul.f32 0.6931472, %v3351_v39  ;;  %v2638_v43 = vsel %vm2637_vm4, %v2635_v53, %v2632_v38 }
 0x55a   :  { %v2639_v45 = vadd.f32 %v2638_v43, %v2625_v40 }
 0x55b   :  { %v2623_v49 = vsel %vm2622_vm5, %v2620_v42, %v2617_v41 }
 0x55c   :  { %v2624_v36 = vadd.f32 %v2623_v49, %v2610_v44  ;;  %v2641_v29 = vrot.slane %v2639_v45, 2 }
 0x55e   :  { %v2643_v50 = vadd.f32 %v2641_v29, %v2624_v36 }
 0x560   :  { %v2645_v46 = vsel %vm2644_vm6, %v2643_v50, 0.0 }
 0x561   :  { %2646 = vadd.xlane.f32.xlu0 %v2645_v46 }
 0x565   :  { %1728 = vadd.xlane.f32.xlu0 %v3772_v47 }
 0x5b8   :  { %v2666_v0 = vpop.permute.xlu1 %2665 }
 0x5b9   :  { %v2668_v47 = vsel %vm2662_vm8, %v2666_v0, 0.0 }
 0x5ee   :  { %v2647_v52 = vpop.xlane.xlu0 %2646 }
 0x5ef   :  { %v2648_v54 = vrot.slane %v2647_v52, 4 }
 0x5f1   :  { %v2649_v55 = vadd.f32 %v2648_v54, %v2647_v52 }
 0x5f2   :  { %v1729_v59 = vpop.xlane.xlu0 %1728 }
 0x5f3   :  { %v2650_v56 = vrot.slane %v2649_v55, 2  ;;  %v1730_v60 = vmul.f32 0.5, %v1729_v59 }
 0x5f5   :  { %v2651_v23 = vadd.f32 %v2650_v56, %v2649_v55  ;;  %v1731_v63 = vadd.f32 940.99304, %v1730_v60 }
 0x5f7   :  { %v2652_v57 = vrot.slane %v2651_v23, 1  ;;  %v2661_v1 = vsel %vm2660_vm7, %v1731_v63, 0.0 }
 0x5f8   :  { %v2669_v51 = vadd.f32 %v2668_v47, %v2661_v1 }
 0x5f9   :  { %v2653_v58 = vadd.f32 %v2652_v57, %v2651_v23 }
 0x5fb   :  { %3175 = vpush %v2653_v58 }
 0x62c   :  { %s3176_s12 = spop %3175 }
 0x62d   :  { %v2655_v2 = vstv %s3176_s12 }
 0x62e   :  { %v2657_v3 = vmul.f32 0.5, %v2655_v2 }
 0x630   :  { %v2671_v4 = vsel %vm2670_vm9, %v2657_v3, 0.0 }
 0x631   :  { %v2672_v5 = vadd.f32 %v2671_v4, %v2669_v51 }
 0x633   :  { %2673 = vst [vmem:[%s3798_s16] sm:$0x3] %v2672_v5 }
 0x634   :  { %2682 = vsyncpa [#allocation6], 1 }
 0x635   :  { %2683 = vsyncpa [#allocation8], 1 }

</bundles_post_ra>
